<compile_context>
chip_gen: v7x
topology: tpu7x:2x2x1
jax: 0.10.0
libtpu: 0.0.40
codegen_flags: <defaults>
</compile_context>

<pallas_src>
import functools

import jax
import jax.numpy as jnp
import numpy as np
from jax.experimental import pallas as pl
from jax.experimental.pallas import tpu as pltpu


def _round_up(v, m):
    return ((v + m - 1) // m) * m


def cbam_flowconv_kernel(x_ref, w_ref, b_ref, w1_ref, b1_ref, w2_ref, b2_ref,
                         mask_ref, o_ref, slab_ref, *, K, Wp, HpWp, inv_dhw):
    """One batch element per grid step.

    x_ref   : (1, Cin_p, L_ext)  f32, channel-padded, spatially padded, flat
    w_ref   : (Cout, KC_pad)     bf16 conv weights, tap-major, zero tail
    b_ref   : (Cout, 1)          f32 conv bias
    w1_ref  : (B, Cout), b1_ref: (B, 1)      shared-MLP layer 1 (f32)
    w2_ref  : (Cout, B), b2_ref: (Cout, 1)   shared-MLP layer 2 (f32)
    mask_ref: (1, L)             f32, 1.0 on valid output positions
    o_ref   : (1, Cout, L)       f32 gated conv output over the wide axis
    slab_ref: (KC_pad, L)        bf16 VMEM scratch: im2col slab
    """
    cin_p = x_ref.shape[1]
    cout = o_ref.shape[1]
    kc_pad, L = slab_ref.shape
    L_ext = x_ref.shape[2]
    n_taps = K * K * K

    # ---- im2col slab build (XLU rolls, aligned bf16 stores) ----------------
    x_full = x_ref[0]                                  # (cin_p, L_ext) f32
    taps_per_store = 2 if cin_p == 8 else 1            # 16-row bf16 packing
    pending = []
    t = 0
    for kd in range(K):
        for kh in range(K):
            base_off = kd * HpWp + kh * Wp
            # Left-rotate by base_off (positive shift form: L_ext - base_off).
            cur = x_full if base_off == 0 else pltpu.roll(
                x_full, L_ext - base_off, axis=1)
            for kw in range(K):
                pending.append(cur[:, :L])             # window for this tap
                t += 1
                if len(pending) == taps_per_store:
                    blk = (pending[0] if taps_per_store == 1
                           else jnp.concatenate(pending, axis=0))
                    slab_ref[(t - taps_per_store) * cin_p:t * cin_p, :] = (
                        blk.astype(slab_ref.dtype))
                    pending = []
                if kw + 1 < K:
                    cur = pltpu.roll(cur, L_ext - 1, axis=1)  # next kw tap

    used = n_taps * cin_p
    if pending:
        # Odd tap count: flush the last window together with the zero rows
        # that pad KC up to kc_pad, as a single aligned 16-row store.
        blk = jnp.concatenate(
            pending + [jnp.zeros((kc_pad - used, L), x_full.dtype)], axis=0)
        slab_ref[(t - len(pending)) * cin_p:, :] = blk.astype(slab_ref.dtype)
    elif kc_pad > used:
        slab_ref[used:, :] = jnp.zeros((kc_pad - used, L), slab_ref.dtype)

    # ---- 3D conv as one fused bf16 MXU matmul (f32 accumulate) -------------
    acc = jnp.dot(w_ref[...], slab_ref[...],
                  preferred_element_type=jnp.float32)            # (Cout, L)
    acc = acc + b_ref[...]                                       # bias bcast

    # ---- CBAM channel attention: masked pooling over valid positions -------
    valid = mask_ref[...] != 0.0                                 # (1, L) bool
    avg = jnp.sum(jnp.where(valid, acc, 0.0),
                  axis=1, keepdims=True) * inv_dhw               # (Cout, 1)
    mx = jnp.max(jnp.where(valid, acc, jnp.float32(-3e38)),
                 axis=1, keepdims=True)                          # (Cout, 1)

    # Shared MLP applied once to the stacked [avg | max] columns.
    col = jax.lax.broadcasted_iota(jnp.int32, (cout, 2), 1)
    pooled = jnp.where(col == 0, avg, mx)                        # (Cout, 2)
    hidden = jnp.maximum(
        jnp.dot(w1_ref[...], pooled, preferred_element_type=jnp.float32)
        + b1_ref[...], 0.0)                                      # (B, 2)
    mlp_out = jnp.dot(w2_ref[...], hidden,
                      preferred_element_type=jnp.float32) + b2_ref[...]
    attn = jax.nn.sigmoid(
        jnp.sum(mlp_out, axis=1, keepdims=True))                 # (Cout, 1)

    o_ref[...] = (acc * attn)[None].astype(o_ref.dtype)


def cbam_flowconv(x, params):
    """Forward pass matching CBAMFlowConv.forward.  Input/output NCDHW."""
    w = params["w"]                                   # (K, K, K, Cin, Cout)
    K = w.shape[0]
    assert K % 2 == 1, "CBAMFlowConv kernel supports odd kernel_size only"
    Cin, Cout = w.shape[3], w.shape[4]
    bneck = params["w1"].shape[0]
    N, _, D, H, W = x.shape
    pad = K // 2
    Dp, Hp, Wp = D + 2 * pad, H + 2 * pad, W + 2 * pad
    HpWp = Hp * Wp

    cin_p = _round_up(max(Cin, 8), 8)            # sublane-aligned channels
    L = _round_up(D * HpWp, 128)                 # lane-dense wide spatial axis
    max_off = (K - 1) * (HpWp + Wp + 1)          # largest tap offset
    L_ext = _round_up(max_off + L, 128)          # flat input length incl halo
    KC = K * K * K * cin_p
    KC_pad = _round_up(KC, 16)                   # bf16 16-row tile aligned

    # Channel-pad, spatially zero-pad, flatten spatial dims, pad the flat axis.
    xp = jnp.pad(x, ((0, 0), (0, cin_p - Cin),
                     (pad, pad), (pad, pad), (pad, pad)))
    x_flat = xp.reshape(N, cin_p, Dp * HpWp)
    x_flat = jnp.pad(x_flat, ((0, 0), (0, 0), (0, L_ext - Dp * HpWp)))

    # Conv weights -> (Cout, KC_pad) bf16, tap-major rows, zero tail columns.
    w_p = jnp.pad(w, ((0, 0), (0, 0), (0, 0), (0, cin_p - Cin), (0, 0)))
    w_mat = jnp.transpose(w_p, (4, 0, 1, 2, 3)).reshape(Cout, KC)
    w_mat = jnp.pad(w_mat, ((0, 0), (0, KC_pad - KC))).astype(jnp.bfloat16)

    # Validity mask over the wide output axis (masks padded h/w cols + tail).
    s = np.arange(L)
    d_i, r = s // HpWp, s % HpWp
    valid = (d_i < D) & (r // Wp < H) & (r % Wp < W)
    mask = jnp.asarray(valid.astype(np.float32)).reshape(1, L)

    kernel = functools.partial(cbam_flowconv_kernel, K=K, Wp=Wp, HpWp=HpWp,
                               inv_dhw=1.0 / float(D * H * W))

    # Explicit VMEM budget: slab + double-buffered in/out blocks + params.
    slab_bytes = KC_pad * L * 2
    xblk_bytes = cin_p * L_ext * 4
    oblk_bytes = Cout * L * 4
    small_bytes = (Cout * KC_pad * 2 + mask.size * 4
                   + 4 * (Cout + bneck * Cout + bneck + Cout * bneck + Cout))
    vmem_limit = int(min(112 << 20,
                         slab_bytes + 2 * (xblk_bytes + oblk_bytes)
                         + 2 * small_bytes + (16 << 20)))

    cost = pl.CostEstimate(
        flops=int(2 * N * Cout * KC_pad * L),
        transcendentals=int(N * Cout),
        bytes_accessed=int(x_flat.size * 4 + N * Cout * L * 4
                           + Cout * KC_pad * 2 + mask.size * 4))

    out_wide = pl.pallas_call(
        kernel,
        out_shape=jax.ShapeDtypeStruct((N, Cout, L), jnp.float32),
        grid_spec=pltpu.PrefetchScalarGridSpec(
            num_scalar_prefetch=0,
            grid=(N,),
            in_specs=[
                pl.BlockSpec((1, cin_p, L_ext), lambda n: (n, 0, 0)),
                pl.BlockSpec((Cout, KC_pad), lambda n: (0, 0)),
                pl.BlockSpec((Cout, 1), lambda n: (0, 0)),
                pl.BlockSpec((bneck, Cout), lambda n: (0, 0)),
                pl.BlockSpec((bneck, 1), lambda n: (0, 0)),
                pl.BlockSpec((Cout, bneck), lambda n: (0, 0)),
                pl.BlockSpec((Cout, 1), lambda n: (0, 0)),
                pl.BlockSpec((1, L), lambda n: (0, 0)),
            ],
            out_specs=pl.BlockSpec((1, Cout, L), lambda n: (n, 0, 0)),
            scratch_shapes=[pltpu.VMEM((KC_pad, L), jnp.bfloat16)],
        ),
        compiler_params=pltpu.CompilerParams(
            dimension_semantics=("parallel",),
            vmem_limit_bytes=vmem_limit),
        cost_estimate=cost,
    )(x_flat, w_mat, params["b"], params["w1"], params["b1"],
      params["w2"], params["b2"], mask)

    # Slice the valid (D, H, W) region out of the wide axis -> NCDHW.
    out = out_wide[:, :, :D * HpWp].reshape(N, Cout, D, Hp, Wp)
    return out[:, :, :, :H, :W]


def init_params(key, in_channels, out_channels, kernel_size=3, reduction=1):
    """Deterministic parameter init mirroring the PyTorch __init__."""
    K = kernel_size
    bneck = max(out_channels // reduction, 3)
    k1, k2, k3 = jax.random.split(key, 3)

    # conv: normal(mean=0, std=1e-5), bias zeros  (torch shape: Cout,Cin,K,K,K)
    conv_w = 1e-5 * jax.random.normal(
        k1, (out_channels, in_channels, K, K, K), jnp.float32)

    # mlp: kaiming_normal(a=0.2) on (B,Cout,1,1,1) / (Cout,B,1,1,1), biases 0.
    a = 0.2
    gain = (2.0 / (1.0 + a * a)) ** 0.5
    mlp_w1 = (gain / (out_channels ** 0.5)) * jax.random.normal(
        k2, (bneck, out_channels), jnp.float32)
    mlp_w2 = (gain / (bneck ** 0.5)) * jax.random.normal(
        k3, (out_channels, bneck), jnp.float32)

    return {
        "w": jnp.transpose(conv_w, (2, 3, 4, 1, 0)),   # (K, K, K, Cin, Cout)
        "b": jnp.zeros((out_channels, 1), jnp.float32),
        "w1": mlp_w1,                                  # (B, Cout)
        "b1": jnp.zeros((bneck, 1), jnp.float32),
        "w2": mlp_w2,                                  # (Cout, B)
        "b2": jnp.zeros((out_channels, 1), jnp.float32),
    }


def reference(x, params):
    """Pure-JAX f32 reference of the same math (for a correctness check)."""
    w = params["w"]
    K = w.shape[0]
    pad = K // 2
    N, Cin, D, H, W = x.shape
    Cout = w.shape[-1]
    xp = jnp.pad(x, ((0, 0), (0, 0), (pad, pad), (pad, pad), (pad, pad)))

    out = jnp.zeros((N, Cout, D, H, W), jnp.float32)
    for kd in range(K):
        for kh in range(K):
            for kw in range(K):
                patch = xp[:, :, kd:kd + D, kh:kh + H, kw:kw + W]
                out = out + jnp.einsum(
                    "ncdhw,co->nodhw", patch, w[kd, kh, kw],
                    precision=jax.lax.Precision.HIGHEST)
    out = out + params["b"].reshape(1, Cout, 1, 1, 1)

    avg = out.mean(axis=(2, 3, 4))          # (N, Cout)
    mx = out.max(axis=(2, 3, 4))            # (N, Cout)

    def mlp(v):
        h = jnp.maximum(v @ params["w1"].T + params["b1"][:, 0], 0.0)
        return h @ params["w2"].T + params["b2"][:, 0]

    attn = jax.nn.sigmoid(mlp(avg) + mlp(mx))
    return out * attn[:, :, None, None, None]


if __name__ == "__main__":
    # Small shapes consistent with the module: N=2, Cin=4, Cout=8, D=H=W=8.
    N, Cin, Cout, D, H, W = 2, 4, 8, 8, 8, 8
    key = jax.random.PRNGKey(0)
    kx, kp = jax.random.split(key)

    x = jax.random.normal(kx, (N, Cin, D, H, W), jnp.float32)
    params = init_params(kp, Cin, Cout, kernel_size=3, reduction=1)

    run = jax.jit(functools.partial(cbam_flowconv, params=params))
    y = run(x)
    jax.block_until_ready(y)

    y_ref = reference(x, params)
    # bf16 MXU operands with f32 accumulation: std-1e-5 conv weights make the
    # outputs ~1e-4, so verify to ~2e-2 relative / 5e-6 absolute.
    np.testing.assert_allclose(np.asarray(y), np.asarray(y_ref),
                               rtol=2e-2, atol=5e-6)
    print("KERNEL_OK")
</pallas_src>

<mosaic_0001>
module attributes {stable_mosaic.version = 11 : i64} {
  func.func @cbam_flowconv_kernel(%arg0: i32, %arg1: memref<1x8x1152xf32, #tpu.memory_space<vmem>>, %arg2: memref<8x224xbf16, #tpu.memory_space<vmem>>, %arg3: memref<8x1xf32, #tpu.memory_space<vmem>>, %arg4: memref<8x8xf32, #tpu.memory_space<vmem>>, %arg5: memref<8x1xf32, #tpu.memory_space<vmem>>, %arg6: memref<8x8xf32, #tpu.memory_space<vmem>>, %arg7: memref<8x1xf32, #tpu.memory_space<vmem>>, %arg8: memref<1x896xf32, #tpu.memory_space<vmem>>, %arg9: memref<1x8x896xf32, #tpu.memory_space<vmem>>, %arg10: memref<224x896xbf16, #tpu.memory_space<vmem>>) attributes {dimension_semantics = [#tpu.dimension_semantics<parallel>], iteration_bounds = array<i64: 2>, scalar_prefetch = 0 : i64, scratch_operands = 1 : i64, tpu.core_type = #tpu.core_type<tc>, window_params = [{transform_indices = @transform_0, window_bounds = array<i64: 1, 8, 1152>}, {pipeline_mode = #tpu.pipeline_mode<synchronous>, transform_indices = @transform_1, window_bounds = array<i64: 8, 224>}, {pipeline_mode = #tpu.pipeline_mode<synchronous>, transform_indices = @transform_2, window_bounds = array<i64: 8, 1>}, {pipeline_mode = #tpu.pipeline_mode<synchronous>, transform_indices = @transform_3, window_bounds = array<i64: 8, 8>}, {pipeline_mode = #tpu.pipeline_mode<synchronous>, transform_indices = @transform_4, window_bounds = array<i64: 8, 1>}, {pipeline_mode = #tpu.pipeline_mode<synchronous>, transform_indices = @transform_5, window_bounds = array<i64: 8, 8>}, {pipeline_mode = #tpu.pipeline_mode<synchronous>, transform_indices = @transform_6, window_bounds = array<i64: 8, 1>}, {pipeline_mode = #tpu.pipeline_mode<synchronous>, transform_indices = @transform_7, window_bounds = array<i64: 1, 896>}, {transform_indices = @transform_8, window_bounds = array<i64: 1, 8, 896>}]} {
    %c0 = arith.constant 0 : index
    %c0_0 = arith.constant 0 : index
    %c0_1 = arith.constant 0 : index
    %0 = vector.load %arg1[%c0, %c0_0, %c0_1] : memref<1x8x1152xf32, #tpu.memory_space<vmem>>, vector<1x8x1152xf32>
    %1 = vector.shape_cast %0 : vector<1x8x1152xf32> to vector<8x1152xf32>
    %2 = vector.extract_strided_slice %1 {offsets = [0, 0], sizes = [8, 896], strides = [1, 1]} : vector<8x1152xf32> to vector<8x896xf32>
    %c1151_i32 = arith.constant 1151 : i32
    %3 = tpu.dynamic_rotate %1 by %c1151_i32 dim 1 : vector<8x1152xf32>, i32 -> vector<8x1152xf32>
    %4 = vector.extract_strided_slice %3 {offsets = [0, 0], sizes = [8, 896], strides = [1, 1]} : vector<8x1152xf32> to vector<8x896xf32>
    %5 = tpu.concatenate %2, %4 in 0 : vector<8x896xf32>, vector<8x896xf32> -> vector<16x896xf32>
    %6 = arith.truncf %5 : vector<16x896xf32> to vector<16x896xbf16>
    %c0_2 = arith.constant 0 : index
    %c0_3 = arith.constant 0 : index
    %7 = vector.load %arg10[%c0_2, %c0_3] : memref<224x896xbf16, #tpu.memory_space<vmem>>, vector<16x896xbf16>
    tpu.vector_store %arg10[%c0_2, %c0_3], %6 {strides = array<i32>} : memref<224x896xbf16, #tpu.memory_space<vmem>>, vector<16x896xbf16>,
    %c1151_i32_4 = arith.constant 1151 : i32
    %8 = tpu.dynamic_rotate %3 by %c1151_i32_4 dim 1 : vector<8x1152xf32>, i32 -> vector<8x1152xf32>
    %9 = vector.extract_strided_slice %8 {offsets = [0, 0], sizes = [8, 896], strides = [1, 1]} : vector<8x1152xf32> to vector<8x896xf32>
    %c1142_i32 = arith.constant 1142 : i32
    %10 = tpu.dynamic_rotate %1 by %c1142_i32 dim 1 : vector<8x1152xf32>, i32 -> vector<8x1152xf32>
    %11 = vector.extract_strided_slice %10 {offsets = [0, 0], sizes = [8, 896], strides = [1, 1]} : vector<8x1152xf32> to vector<8x896xf32>
    %12 = tpu.concatenate %9, %11 in 0 : vector<8x896xf32>, vector<8x896xf32> -> vector<16x896xf32>
    %13 = arith.truncf %12 : vector<16x896xf32> to vector<16x896xbf16>
    %c16 = arith.constant 16 : index
    %c0_5 = arith.constant 0 : index
    %14 = vector.load %arg10[%c16, %c0_5] : memref<224x896xbf16, #tpu.memory_space<vmem>>, vector<16x896xbf16>
    tpu.vector_store %arg10[%c16, %c0_5], %13 {strides = array<i32>} : memref<224x896xbf16, #tpu.memory_space<vmem>>, vector<16x896xbf16>,
    %c1151_i32_6 = arith.constant 1151 : i32
    %15 = tpu.dynamic_rotate %10 by %c1151_i32_6 dim 1 : vector<8x1152xf32>, i32 -> vector<8x1152xf32>
    %16 = vector.extract_strided_slice %15 {offsets = [0, 0], sizes = [8, 896], strides = [1, 1]} : vector<8x1152xf32> to vector<8x896xf32>
    %c1151_i32_7 = arith.constant 1151 : i32
    %17 = tpu.dynamic_rotate %15 by %c1151_i32_7 dim 1 : vector<8x1152xf32>, i32 -> vector<8x1152xf32>
    %18 = vector.extract_strided_slice %17 {offsets = [0, 0], sizes = [8, 896], strides = [1, 1]} : vector<8x1152xf32> to vector<8x896xf32>
    %19 = tpu.concatenate %16, %18 in 0 : vector<8x896xf32>, vector<8x896xf32> -> vector<16x896xf32>
    %20 = arith.truncf %19 : vector<16x896xf32> to vector<16x896xbf16>
    %c32 = arith.constant 32 : index
    %c0_8 = arith.constant 0 : index
    %21 = vector.load %arg10[%c32, %c0_8] : memref<224x896xbf16, #tpu.memory_space<vmem>>, vector<16x896xbf16>
    tpu.vector_store %arg10[%c32, %c0_8], %20 {strides = array<i32>} : memref<224x896xbf16, #tpu.memory_space<vmem>>, vector<16x896xbf16>,
    %c1132_i32 = arith.constant 1132 : i32
    %22 = tpu.dynamic_rotate %1 by %c1132_i32 dim 1 : vector<8x1152xf32>, i32 -> vector<8x1152xf32>
    %23 = vector.extract_strided_slice %22 {offsets = [0, 0], sizes = [8, 896], strides = [1, 1]} : vector<8x1152xf32> to vector<8x896xf32>
    %c1151_i32_9 = arith.constant 1151 : i32
    %24 = tpu.dynamic_rotate %22 by %c1151_i32_9 dim 1 : vector<8x1152xf32>, i32 -> vector<8x1152xf32>
    %25 = vector.extract_strided_slice %24 {offsets = [0, 0], sizes = [8, 896], strides = [1, 1]} : vector<8x1152xf32> to vector<8x896xf32>
    %26 = tpu.concatenate %23, %25 in 0 : vector<8x896xf32>, vector<8x896xf32> -> vector<16x896xf32>
    %27 = arith.truncf %26 : vector<16x896xf32> to vector<16x896xbf16>
    %c48 = arith.constant 48 : index
    %c0_10 = arith.constant 0 : index
    %28 = vector.load %arg10[%c48, %c0_10] : memref<224x896xbf16, #tpu.memory_space<vmem>>, vector<16x896xbf16>
    tpu.vector_store %arg10[%c48, %c0_10], %27 {strides = array<i32>} : memref<224x896xbf16, #tpu.memory_space<vmem>>, vector<16x896xbf16>,
    %c1151_i32_11 = arith.constant 1151 : i32
    %29 = tpu.dynamic_rotate %24 by %c1151_i32_11 dim 1 : vector<8x1152xf32>, i32 -> vector<8x1152xf32>
    %30 = vector.extract_strided_slice %29 {offsets = [0, 0], sizes = [8, 896], strides = [1, 1]} : vector<8x1152xf32> to vector<8x896xf32>
    %c1052_i32 = arith.constant 1052 : i32
    %31 = tpu.dynamic_rotate %1 by %c1052_i32 dim 1 : vector<8x1152xf32>, i32 -> vector<8x1152xf32>
    %32 = vector.extract_strided_slice %31 {offsets = [0, 0], sizes = [8, 896], strides = [1, 1]} : vector<8x1152xf32> to vector<8x896xf32>
    %33 = tpu.concatenate %30, %32 in 0 : vector<8x896xf32>, vector<8x896xf32> -> vector<16x896xf32>
    %34 = arith.truncf %33 : vector<16x896xf32> to vector<16x896xbf16>
    %c64 = arith.constant 64 : index
    %c0_12 = arith.constant 0 : index
    %35 = vector.load %arg10[%c64, %c0_12] : memref<224x896xbf16, #tpu.memory_space<vmem>>, vector<16x896xbf16>
    tpu.vector_store %arg10[%c64, %c0_12], %34 {strides = array<i32>} : memref<224x896xbf16, #tpu.memory_space<vmem>>, vector<16x896xbf16>,
    %c1151_i32_13 = arith.constant 1151 : i32
    %36 = tpu.dynamic_rotate %31 by %c1151_i32_13 dim 1 : vector<8x1152xf32>, i32 -> vector<8x1152xf32>
    %37 = vector.extract_strided_slice %36 {offsets = [0, 0], sizes = [8, 896], strides = [1, 1]} : vector<8x1152xf32> to vector<8x896xf32>
    %c1151_i32_14 = arith.constant 1151 : i32
    %38 = tpu.dynamic_rotate %36 by %c1151_i32_14 dim 1 : vector<8x1152xf32>, i32 -> vector<8x1152xf32>
    %39 = vector.extract_strided_slice %38 {offsets = [0, 0], sizes = [8, 896], strides = [1, 1]} : vector<8x1152xf32> to vector<8x896xf32>
    %40 = tpu.concatenate %37, %39 in 0 : vector<8x896xf32>, vector<8x896xf32> -> vector<16x896xf32>
    %41 = arith.truncf %40 : vector<16x896xf32> to vector<16x896xbf16>
    %c80 = arith.constant 80 : index
    %c0_15 = arith.constant 0 : index
    %42 = vector.load %arg10[%c80, %c0_15] : memref<224x896xbf16, #tpu.memory_space<vmem>>, vector<16x896xbf16>
    tpu.vector_store %arg10[%c80, %c0_15], %41 {strides = array<i32>} : memref<224x896xbf16, #tpu.memory_space<vmem>>, vector<16x896xbf16>,
    %c1042_i32 = arith.constant 1042 : i32
    %43 = tpu.dynamic_rotate %1 by %c1042_i32 dim 1 : vector<8x1152xf32>, i32 -> vector<8x1152xf32>
    %44 = vector.extract_strided_slice %43 {offsets = [0, 0], sizes = [8, 896], strides = [1, 1]} : vector<8x1152xf32> to vector<8x896xf32>
    %c1151_i32_16 = arith.constant 1151 : i32
    %45 = tpu.dynamic_rotate %43 by %c1151_i32_16 dim 1 : vector<8x1152xf32>, i32 -> vector<8x1152xf32>
    %46 = vector.extract_strided_slice %45 {offsets = [0, 0], sizes = [8, 896], strides = [1, 1]} : vector<8x1152xf32> to vector<8x896xf32>
    %47 = tpu.concatenate %44, %46 in 0 : vector<8x896xf32>, vector<8x896xf32> -> vector<16x896xf32>
    %48 = arith.truncf %47 : vector<16x896xf32> to vector<16x896xbf16>
    %c96 = arith.constant 96 : index
    %c0_17 = arith.constant 0 : index
    %49 = vector.load %arg10[%c96, %c0_17] : memref<224x896xbf16, #tpu.memory_space<vmem>>, vector<16x896xbf16>
    tpu.vector_store %arg10[%c96, %c0_17], %48 {strides = array<i32>} : memref<224x896xbf16, #tpu.memory_space<vmem>>, vector<16x896xbf16>,
    %c1151_i32_18 = arith.constant 1151 : i32
    %50 = tpu.dynamic_rotate %45 by %c1151_i32_18 dim 1 : vector<8x1152xf32>, i32 -> vector<8x1152xf32>
    %51 = vector.extract_strided_slice %50 {offsets = [0, 0], sizes = [8, 896], strides = [1, 1]} : vector<8x1152xf32> to vector<8x896xf32>
    %c1032_i32 = arith.constant 1032 : i32
    %52 = tpu.dynamic_rotate %1 by %c1032_i32 dim 1 : vector<8x1152xf32>, i32 -> vector<8x1152xf32>
    %53 = vector.extract_strided_slice %52 {offsets = [0, 0], sizes = [8, 896], strides = [1, 1]} : vector<8x1152xf32> to vector<8x896xf32>
    %54 = tpu.concatenate %51, %53 in 0 : vector<8x896xf32>, vector<8x896xf32> -> vector<16x896xf32>
    %55 = arith.truncf %54 : vector<16x896xf32> to vector<16x896xbf16>
    %c112 = arith.constant 112 : index
    %c0_19 = arith.constant 0 : index
    %56 = vector.load %arg10[%c112, %c0_19] : memref<224x896xbf16, #tpu.memory_space<vmem>>, vector<16x896xbf16>
    tpu.vector_store %arg10[%c112, %c0_19], %55 {strides = array<i32>} : memref<224x896xbf16, #tpu.memory_space<vmem>>, vector<16x896xbf16>,
    %c1151_i32_20 = arith.constant 1151 : i32
    %57 = tpu.dynamic_rotate %52 by %c1151_i32_20 dim 1 : vector<8x1152xf32>, i32 -> vector<8x1152xf32>
    %58 = vector.extract_strided_slice %57 {offsets = [0, 0], sizes = [8, 896], strides = [1, 1]} : vector<8x1152xf32> to vector<8x896xf32>
    %c1151_i32_21 = arith.constant 1151 : i32
    %59 = tpu.dynamic_rotate %57 by %c1151_i32_21 dim 1 : vector<8x1152xf32>, i32 -> vector<8x1152xf32>
    %60 = vector.extract_strided_slice %59 {offsets = [0, 0], sizes = [8, 896], strides = [1, 1]} : vector<8x1152xf32> to vector<8x896xf32>
    %61 = tpu.concatenate %58, %60 in 0 : vector<8x896xf32>, vector<8x896xf32> -> vector<16x896xf32>
    %62 = arith.truncf %61 : vector<16x896xf32> to vector<16x896xbf16>
    %c128 = arith.constant 128 : index
    %c0_22 = arith.constant 0 : index
    %63 = vector.load %arg10[%c128, %c0_22] : memref<224x896xbf16, #tpu.memory_space<vmem>>, vector<16x896xbf16>
    tpu.vector_store %arg10[%c128, %c0_22], %62 {strides = array<i32>} : memref<224x896xbf16, #tpu.memory_space<vmem>>, vector<16x896xbf16>,
    %c952_i32 = arith.constant 952 : i32
    %64 = tpu.dynamic_rotate %1 by %c952_i32 dim 1 : vector<8x1152xf32>, i32 -> vector<8x1152xf32>
    %65 = vector.extract_strided_slice %64 {offsets = [0, 0], sizes = [8, 896], strides = [1, 1]} : vector<8x1152xf32> to vector<8x896xf32>
    %c1151_i32_23 = arith.constant 1151 : i32
    %66 = tpu.dynamic_rotate %64 by %c1151_i32_23 dim 1 : vector<8x1152xf32>, i32 -> vector<8x1152xf32>
    %67 = vector.extract_strided_slice %66 {offsets = [0, 0], sizes = [8, 896], strides = [1, 1]} : vector<8x1152xf32> to vector<8x896xf32>
    %68 = tpu.concatenate %65, %67 in 0 : vector<8x896xf32>, vector<8x896xf32> -> vector<16x896xf32>
    %69 = arith.truncf %68 : vector<16x896xf32> to vector<16x896xbf16>
    %c144 = arith.constant 144 : index
    %c0_24 = arith.constant 0 : index
    %70 = vector.load %arg10[%c144, %c0_24] : memref<224x896xbf16, #tpu.memory_space<vmem>>, vector<16x896xbf16>
    tpu.vector_store %arg10[%c144, %c0_24], %69 {strides = array<i32>} : memref<224x896xbf16, #tpu.memory_space<vmem>>, vector<16x896xbf16>,
    %c1151_i32_25 = arith.constant 1151 : i32
    %71 = tpu.dynamic_rotate %66 by %c1151_i32_25 dim 1 : vector<8x1152xf32>, i32 -> vector<8x1152xf32>
    %72 = vector.extract_strided_slice %71 {offsets = [0, 0], sizes = [8, 896], strides = [1, 1]} : vector<8x1152xf32> to vector<8x896xf32>
    %c942_i32 = arith.constant 942 : i32
    %73 = tpu.dynamic_rotate %1 by %c942_i32 dim 1 : vector<8x1152xf32>, i32 -> vector<8x1152xf32>
    %74 = vector.extract_strided_slice %73 {offsets = [0, 0], sizes = [8, 896], strides = [1, 1]} : vector<8x1152xf32> to vector<8x896xf32>
    %75 = tpu.concatenate %72, %74 in 0 : vector<8x896xf32>, vector<8x896xf32> -> vector<16x896xf32>
    %76 = arith.truncf %75 : vector<16x896xf32> to vector<16x896xbf16>
    %c160 = arith.constant 160 : index
    %c0_26 = arith.constant 0 : index
    %77 = vector.load %arg10[%c160, %c0_26] : memref<224x896xbf16, #tpu.memory_space<vmem>>, vector<16x896xbf16>
    tpu.vector_store %arg10[%c160, %c0_26], %76 {strides = array<i32>} : memref<224x896xbf16, #tpu.memory_space<vmem>>, vector<16x896xbf16>,
    %c1151_i32_27 = arith.constant 1151 : i32
    %78 = tpu.dynamic_rotate %73 by %c1151_i32_27 dim 1 : vector<8x1152xf32>, i32 -> vector<8x1152xf32>
    %79 = vector.extract_strided_slice %78 {offsets = [0, 0], sizes = [8, 896], strides = [1, 1]} : vector<8x1152xf32> to vector<8x896xf32>
    %c1151_i32_28 = arith.constant 1151 : i32
    %80 = tpu.dynamic_rotate %78 by %c1151_i32_28 dim 1 : vector<8x1152xf32>, i32 -> vector<8x1152xf32>
    %81 = vector.extract_strided_slice %80 {offsets = [0, 0], sizes = [8, 896], strides = [1, 1]} : vector<8x1152xf32> to vector<8x896xf32>
    %82 = tpu.concatenate %79, %81 in 0 : vector<8x896xf32>, vector<8x896xf32> -> vector<16x896xf32>
    %83 = arith.truncf %82 : vector<16x896xf32> to vector<16x896xbf16>
    %c176 = arith.constant 176 : index
    %c0_29 = arith.constant 0 : index
    %84 = vector.load %arg10[%c176, %c0_29] : memref<224x896xbf16, #tpu.memory_space<vmem>>, vector<16x896xbf16>
    tpu.vector_store %arg10[%c176, %c0_29], %83 {strides = array<i32>} : memref<224x896xbf16, #tpu.memory_space<vmem>>, vector<16x896xbf16>,
    %c932_i32 = arith.constant 932 : i32
    %85 = tpu.dynamic_rotate %1 by %c932_i32 dim 1 : vector<8x1152xf32>, i32 -> vector<8x1152xf32>
    %86 = vector.extract_strided_slice %85 {offsets = [0, 0], sizes = [8, 896], strides = [1, 1]} : vector<8x1152xf32> to vector<8x896xf32>
    %c1151_i32_30 = arith.constant 1151 : i32
    %87 = tpu.dynamic_rotate %85 by %c1151_i32_30 dim 1 : vector<8x1152xf32>, i32 -> vector<8x1152xf32>
    %88 = vector.extract_strided_slice %87 {offsets = [0, 0], sizes = [8, 896], strides = [1, 1]} : vector<8x1152xf32> to vector<8x896xf32>
    %89 = tpu.concatenate %86, %88 in 0 : vector<8x896xf32>, vector<8x896xf32> -> vector<16x896xf32>
    %90 = arith.truncf %89 : vector<16x896xf32> to vector<16x896xbf16>
    %c192 = arith.constant 192 : index
    %c0_31 = arith.constant 0 : index
    %91 = vector.load %arg10[%c192, %c0_31] : memref<224x896xbf16, #tpu.memory_space<vmem>>, vector<16x896xbf16>
    tpu.vector_store %arg10[%c192, %c0_31], %90 {strides = array<i32>} : memref<224x896xbf16, #tpu.memory_space<vmem>>, vector<16x896xbf16>,
    %c1151_i32_32 = arith.constant 1151 : i32
    %92 = tpu.dynamic_rotate %87 by %c1151_i32_32 dim 1 : vector<8x1152xf32>, i32 -> vector<8x1152xf32>
    %93 = vector.extract_strided_slice %92 {offsets = [0, 0], sizes = [8, 896], strides = [1, 1]} : vector<8x1152xf32> to vector<8x896xf32>
    %cst = arith.constant 0.000000e+00 : f32
    %94 = vector.broadcast %cst : f32 to vector<8x896xf32>
    %95 = tpu.concatenate %93, %94 in 0 : vector<8x896xf32>, vector<8x896xf32> -> vector<16x896xf32>
    %96 = arith.truncf %95 : vector<16x896xf32> to vector<16x896xbf16>
    %c208 = arith.constant 208 : index
    %c0_33 = arith.constant 0 : index
    %97 = vector.load %arg10[%c208, %c0_33] : memref<224x896xbf16, #tpu.memory_space<vmem>>, vector<16x896xbf16>
    tpu.vector_store %arg10[%c208, %c0_33], %96 {strides = array<i32>} : memref<224x896xbf16, #tpu.memory_space<vmem>>, vector<16x896xbf16>,
    %c0_34 = arith.constant 0 : index
    %c0_35 = arith.constant 0 : index
    %98 = vector.load %arg2[%c0_34, %c0_35] : memref<8x224xbf16, #tpu.memory_space<vmem>>, vector<8x224xbf16>
    %c0_36 = arith.constant 0 : index
    %c0_37 = arith.constant 0 : index
    %99 = vector.load %arg10[%c0_36, %c0_37] : memref<224x896xbf16, #tpu.memory_space<vmem>>, vector<224x896xbf16>
    %cst_38 = arith.constant dense<0.000000e+00> : vector<8x896xf32>
    %100 = tpu.matmul %98, %99, %cst_38 {dimension_numbers = #tpu.dot_dimension_numbers<[1], [0], [0], [1], [0, 0, 1, 1], [], []>} : vector<8x224xbf16>, vector<224x896xbf16>, vector<8x896xf32> -> vector<8x896xf32>
    %c0_39 = arith.constant 0 : index
    %c0_40 = arith.constant 0 : index
    %101 = vector.load %arg3[%c0_39, %c0_40] : memref<8x1xf32, #tpu.memory_space<vmem>>, vector<8x1xf32>
    %102 = vector.broadcast %101 : vector<8x1xf32> to vector<8x896xf32>
    %103 = arith.addf %100, %102 : vector<8x896xf32>
    %c0_41 = arith.constant 0 : index
    %c0_42 = arith.constant 0 : index
    %104 = vector.load %arg8[%c0_41, %c0_42] : memref<1x896xf32, #tpu.memory_space<vmem>>, vector<1x896xf32>
    %cst_43 = arith.constant 0.000000e+00 : f32
    %105 = vector.broadcast %cst_43 : f32 to vector<1x896xf32>
    %106 = arith.cmpf one, %104, %105 : vector<1x896xf32>
    %cst_44 = arith.constant 0.000000e+00 : f32
    %107 = vector.shape_cast %106 : vector<1x896xi1> to vector<1x896xi1>
    %108 = vector.broadcast %107 : vector<1x896xi1> to vector<8x896xi1>
    %109 = vector.broadcast %cst_44 : f32 to vector<8x896xf32>
    %110 = arith.select %108, %103, %109 : vector<8x896xi1>, vector<8x896xf32>
    %cst_45 = arith.constant dense<0.000000e+00> : vector<8xf32>
    %111 = vector.multi_reduction <add>, %110, %cst_45 [1] : vector<8x896xf32> to vector<8xf32>
    %112 = vector.shape_cast %111 : vector<8xf32> to vector<8x1xf32>
    %cst_46 = arith.constant 0.001953125 : f32
    %113 = vector.broadcast %cst_46 : f32 to vector<8x1xf32>
    %114 = arith.mulf %112, %113 : vector<8x1xf32>
    %cst_47 = arith.constant -3.000000e+38 : f32
    %115 = vector.shape_cast %106 : vector<1x896xi1> to vector<1x896xi1>
    %116 = vector.broadcast %115 : vector<1x896xi1> to vector<8x896xi1>
    %117 = vector.broadcast %cst_47 : f32 to vector<8x896xf32>
    %118 = arith.select %116, %103, %117 : vector<8x896xi1>, vector<8x896xf32>
    %cst_48 = arith.constant dense<0xFF800000> : vector<8xf32>
    %119 = vector.multi_reduction <maximumf>, %118, %cst_48 [1] : vector<8x896xf32> to vector<8xf32>
    %120 = vector.shape_cast %119 : vector<8xf32> to vector<8x1xf32>
    %121 = tpu.iota {dimensions = array<i32: 1>} : vector<8x2xi32>
    %c0_i32 = arith.constant 0 : i32
    %122 = vector.broadcast %c0_i32 : i32 to vector<8x2xi32>
    %123 = arith.cmpi eq, %121, %122 : vector<8x2xi32>
    %124 = vector.shape_cast %114 : vector<8x1xf32> to vector<8x1xf32>
    %125 = vector.broadcast %124 : vector<8x1xf32> to vector<8x2xf32>
    %126 = vector.shape_cast %120 : vector<8x1xf32> to vector<8x1xf32>
    %127 = vector.broadcast %126 : vector<8x1xf32> to vector<8x2xf32>
    %128 = arith.select %123, %125, %127 : vector<8x2xi1>, vector<8x2xf32>
    %c0_49 = arith.constant 0 : index
    %c0_50 = arith.constant 0 : index
    %129 = vector.load %arg4[%c0_49, %c0_50] : memref<8x8xf32, #tpu.memory_space<vmem>>, vector<8x8xf32>
    %cst_51 = arith.constant dense<0.000000e+00> : vector<8x2xf32>
    %130 = tpu.matmul %129, %128, %cst_51 {dimension_numbers = #tpu.dot_dimension_numbers<[1], [0], [0], [1], [0, 0, 1, 1], [], []>} : vector<8x8xf32>, vector<8x2xf32>, vector<8x2xf32> -> vector<8x2xf32>
    %c0_52 = arith.constant 0 : index
    %c0_53 = arith.constant 0 : index
    %131 = vector.load %arg5[%c0_52, %c0_53] : memref<8x1xf32, #tpu.memory_space<vmem>>, vector<8x1xf32>
    %132 = vector.broadcast %131 : vector<8x1xf32> to vector<8x2xf32>
    %133 = arith.addf %130, %132 : vector<8x2xf32>
    %cst_54 = arith.constant 0.000000e+00 : f32
    %134 = vector.broadcast %cst_54 : f32 to vector<8x2xf32>
    %135 = arith.maximumf %133, %134 : vector<8x2xf32>
    %c0_55 = arith.constant 0 : index
    %c0_56 = arith.constant 0 : index
    %136 = vector.load %arg6[%c0_55, %c0_56] : memref<8x8xf32, #tpu.memory_space<vmem>>, vector<8x8xf32>
    %cst_57 = arith.constant dense<0.000000e+00> : vector<8x2xf32>
    %137 = tpu.matmul %136, %135, %cst_57 {dimension_numbers = #tpu.dot_dimension_numbers<[1], [0], [0], [1], [0, 0, 1, 1], [], []>} : vector<8x8xf32>, vector<8x2xf32>, vector<8x2xf32> -> vector<8x2xf32>
    %c0_58 = arith.constant 0 : index
    %c0_59 = arith.constant 0 : index
    %138 = vector.load %arg7[%c0_58, %c0_59] : memref<8x1xf32, #tpu.memory_space<vmem>>, vector<8x1xf32>
    %139 = vector.broadcast %138 : vector<8x1xf32> to vector<8x2xf32>
    %140 = arith.addf %137, %139 : vector<8x2xf32>
    %cst_60 = arith.constant dense<0.000000e+00> : vector<8xf32>
    %141 = vector.multi_reduction <add>, %140, %cst_60 [1] : vector<8x2xf32> to vector<8xf32>
    %142 = vector.shape_cast %141 : vector<8xf32> to vector<8x1xf32>
    %143 = arith.negf %142 : vector<8x1xf32>
    %144 = math.exp %143 : vector<8x1xf32>
    %cst_61 = arith.constant 1.000000e+00 : f32
    %145 = vector.broadcast %cst_61 : f32 to vector<8x1xf32>
    %146 = arith.addf %145, %144 : vector<8x1xf32>
    %147 = arith.divf %145, %146 : vector<8x1xf32>
    %148 = vector.broadcast %147 : vector<8x1xf32> to vector<8x896xf32>
    %149 = arith.mulf %103, %148 : vector<8x896xf32>
    %150 = vector.shape_cast %149 : vector<8x896xf32> to vector<1x8x896xf32>
    %c0_62 = arith.constant 0 : index
    %c0_63 = arith.constant 0 : index
    %c0_64 = arith.constant 0 : index
    %151 = vector.load %arg9[%c0_62, %c0_63, %c0_64] : memref<1x8x896xf32, #tpu.memory_space<vmem>>, vector<1x8x896xf32>
    tpu.vector_store %arg9[%c0_62, %c0_63, %c0_64], %150 {strides = array<i32>} : memref<1x8x896xf32, #tpu.memory_space<vmem>>, vector<1x8x896xf32>,
    return
  }
  func.func @transform_0(%arg0: i32) -> (i32, i32, i32) {
    %c0_i32 = arith.constant 0 : i32
    %c0_i32_0 = arith.constant 0 : i32
    %c0_i32_1 = arith.constant 0 : i32
    return %arg0, %c0_i32, %c0_i32_0 : i32, i32, i32
  }
  func.func @transform_1(%arg0: i32) -> (i32, i32) {
    %c0_i32 = arith.constant 0 : i32
    %c0_i32_0 = arith.constant 0 : i32
    %c0_i32_1 = arith.constant 0 : i32
    return %c0_i32, %c0_i32_0 : i32, i32
  }
  func.func @transform_2(%arg0: i32) -> (i32, i32) {
    %c0_i32 = arith.constant 0 : i32
    %c0_i32_0 = arith.constant 0 : i32
    %c0_i32_1 = arith.constant 0 : i32
    return %c0_i32, %c0_i32_0 : i32, i32
  }
  func.func @transform_3(%arg0: i32) -> (i32, i32) {
    %c0_i32 = arith.constant 0 : i32
    %c0_i32_0 = arith.constant 0 : i32
    %c0_i32_1 = arith.constant 0 : i32
    return %c0_i32, %c0_i32_0 : i32, i32
  }
  func.func @transform_4(%arg0: i32) -> (i32, i32) {
    %c0_i32 = arith.constant 0 : i32
    %c0_i32_0 = arith.constant 0 : i32
    %c0_i32_1 = arith.constant 0 : i32
    return %c0_i32, %c0_i32_0 : i32, i32
  }
  func.func @transform_5(%arg0: i32) -> (i32, i32) {
    %c0_i32 = arith.constant 0 : i32
    %c0_i32_0 = arith.constant 0 : i32
    %c0_i32_1 = arith.constant 0 : i32
    return %c0_i32, %c0_i32_0 : i32, i32
  }
  func.func @transform_6(%arg0: i32) -> (i32, i32) {
    %c0_i32 = arith.constant 0 : i32
    %c0_i32_0 = arith.constant 0 : i32
    %c0_i32_1 = arith.constant 0 : i32
    return %c0_i32, %c0_i32_0 : i32, i32
  }
  func.func @transform_7(%arg0: i32) -> (i32, i32) {
    %c0_i32 = arith.constant 0 : i32
    %c0_i32_0 = arith.constant 0 : i32
    %c0_i32_1 = arith.constant 0 : i32
    return %c0_i32, %c0_i32_0 : i32, i32
  }
  func.func @transform_8(%arg0: i32) -> (i32, i32, i32) {
    %c0_i32 = arith.constant 0 : i32
    %c0_i32_0 = arith.constant 0 : i32
    %c0_i32_1 = arith.constant 0 : i32
    return %arg0, %c0_i32, %c0_i32_0 : i32, i32, i32
  }
}

</mosaic_0001>

<bundles_post_ra>
// kernel: cbam_flowconv.1
= control target key start
LH: loop header
LB: loop body
LE: loop exit
PB: predicated region body
PF: predicated region fallthrough
CT: control target
= control target key end

     0   :  { %s2435_s27 = smov 0   ;;  %s3942_s0 = inlined_call_operand.vmem [shape: f32[2,8,1152], index: 0, kind: input, shape index: {}]   ;;  %s3943_s1 = inlined_call_operand.vmem [shape: bf16[8,224], index: 1, kind: input, shape index: {}]   ;;  %s3944_s2 = inlined_call_operand.vmem [shape: f32[8,1], index: 2, kind: input, shape index: {}, may-alias: {2,4,6}]   ;;  %s3945_s3 = inlined_call_operand.vmem [shape: f32[8,8], index: 3, kind: input, shape index: {}]   ;;  %s3946_s4 = inlined_call_operand.vmem [shape: f32[8,1], index: 4, kind: input, shape index: {}, may-alias: {2,4,6}]   ;;  %s3947_s5 = inlined_call_operand.vmem [shape: f32[8,8], index: 5, kind: input, shape index: {}]   ;;  %s3948_s6 = inlined_call_operand.vmem [shape: f32[8,1], index: 6, kind: input, shape index: {}, may-alias: {2,4,6}]   ;;  %s3949_s7 = inlined_call_operand.vmem [shape: f32[1,896], index: 7, kind: input, shape index: {}]   ;;  %s3950_s8 = inlined_call_operand.vmem [shape: f32[2,8,896], index: 8, kind: output, shape index: {}]  }
   0x1 LB: > { %s1770_s28 = sadd.s32 4294967295, %s2376_s27   ;;  %p1774_p0 = scmp.ge.s32.totalorder %s2376_s27, 1  ;;  %s2376_s27 = sphi %s2435_s27, %s18_s27  }
   0x2   : > { %p262_p1 = scmp.lt.s32.totalorder %s2376_s27, 3 }
   0x4   : > { %p263_p2 = pnand %p1774_p0, %p262_p1 }
   0x6   : > { %266 = sbr.rel (%p263_p2) target bundleno = 1535 (0x5ff), region = 52 }
   0xd   : > { %p296_p3 = scmp.lt.s32.totalorder %s1770_s28, 1  ;;  %s2378_s11 = smov 118   ;;  %v3951_v18 = vlaneseq  ;;  %vm1291_vm9 = vcmask 785408  }
   0xe   : > { %s2379_s12 = smov 108   ;;  %s2380_s13 = smov 28  }
   0xf   : > { %s4210_s28 = smov (!%p296_p3, %s1770_s28), 1  ;;  %s2381_s14 = smov 18   ;;  %v2524_v20 = vand.u32 127, %v3951_v18 }
  0x10   : > { %s1802_s29 = smul.u32 72, %s4210_s28  ;;  %s2382_s15 = smov 8  }
  0x11   : > { %s2383_s16 = smov 56   ;;  %s2384_s17 = smov 46   ;;  %vm400_vm0 = vcmp.lt.s32.totalorder %v2524_v20, 118  ;;  %vm505_vm1 = vcmp.lt.s32.totalorder %v2524_v20, 108  ;;  %vm596_vm2 = vcmp.lt.s32.totalorder %v2524_v20, 28  ;;  %vm701_vm3 = vcmp.lt.s32.totalorder %v2524_v20, 18 }
  0x12   : > { %s2449_s10 = scalar_lea.vmem %s3942_s0, %s1802_s29  ;;  %s2385_s18 = smov 36   ;;  %vm792_vm4 = vcmp.lt.s32.totalorder %v2524_v20, 8  ;;  %vm897_vm5 = vcmp.lt.s32.totalorder %v2524_v20, 56  ;;  %vm988_vm6 = vcmp.lt.s32.totalorder %v2524_v20, 46  ;;  %vm1093_vm7 = vcmp.lt.s32.totalorder %v2524_v20, 36 }
  0x13   : > { %v2452_v0 = vld [vmem:[%s2449_s10 + $0x8] sm:$0xff]  ;;  %v2455_v1 = vld [vmem:[%s2449_s10 + $0x10] sm:$0xff]  ;;  %v2458_v2 = vld [vmem:[%s2449_s10] sm:$0xff]  ;;  %s2386_s19 = smov 127   ;;  %vm336_vm8 = vcmp.lt.s32.totalorder %v2524_v20, 127 }
  0x14   : > { %v1824_v3 = vpack.i.bf16 %v2455_v1, %v2452_v0  ;;  %v312_v4 = vld [vmem:[%s2449_s10 + $0x28] sm:$0xff]  ;;  %v2464_v5 = vld [vmem:[%s2449_s10 + $0x18] sm:$0xff]  ;;  %v311_v6 = vld [vmem:[%s2449_s10 + $0x20] sm:$0xff] }
  0x15   : > { %v1834_v7 = vpack.i.bf16 %v312_v4, %v2458_v2  ;;  %v313_v8 = vld [vmem:[%s2449_s10 + $0x30] sm:$0xff]  ;;  %v314_v9 = vld [vmem:[%s2449_s10 + $0x38] sm:$0xff]  ;;  %v1829_v10 = vpack.i.bf16 %v311_v6, %v2464_v5  ;;  %v1924_v12 = vpack.i.bf16 %v2464_v5, %v2455_v1  ;;  %v1929_v13 = vpack.i.bf16 %v312_v4, %v311_v6  ;;  %v2507_v17 = vld [vmem:[%s2449_s10 + $0x40] sm:$0xff] }
  0x16   : > { %1825 = vrot.lane.b32.xlu0 %v1824_v3, %s2378_s11  ;;  %v2473_v11 = vpack.i.bf16 %v314_v9, %v313_v8  ;;  %v1934_v14 = vpack.i.bf16 %v313_v8, %v2452_v0  ;;  %v1939_v15 = vpack.i.bf16 %v2458_v2, %v314_v9  ;;  %v1989_v16 = vpack.i.bf16 %v2458_v2, %v2464_v5 }
  0x17   : > { %1835 = vrot.lane.b32.xlu1 %v1834_v7, %s2378_s11 }
  0x1a   : > { %1830 = vrot.lane.b32.xlu0 %v1829_v10, %s2378_s11 }
  0x1b   : > { %1840 = vrot.lane.b32.xlu1 %v2473_v11, %s2378_s11 }
  0x1e   : > { %1845 = vrot.lane.b32.xlu0 %v1824_v3, %s2379_s12 }
  0x1f   : > { %1850 = vrot.lane.b32.xlu1 %v1829_v10, %s2379_s12 }
  0x22   : > { %1855 = vrot.lane.b32.xlu0 %v1834_v7, %s2379_s12 }
  0x23   : > { %1860 = vrot.lane.b32.xlu1 %v2473_v11, %s2379_s12 }
  0x26   : > { %1865 = vrot.lane.b32.xlu0 %v1824_v3, %s2380_s13 }
  0x27   : > { %1870 = vrot.lane.b32.xlu1 %v1829_v10, %s2380_s13 }
  0x2a   : > { %1875 = vrot.lane.b32.xlu0 %v1834_v7, %s2380_s13 }
  0x2b   : > { %1880 = vrot.lane.b32.xlu1 %v2473_v11, %s2380_s13 }
  0x2e   : > { %1885 = vrot.lane.b32.xlu0 %v1824_v3, %s2381_s14 }
  0x2f   : > { %1890 = vrot.lane.b32.xlu1 %v1829_v10, %s2381_s14 }
  0x32   : > { %1895 = vrot.lane.b32.xlu0 %v1834_v7, %s2381_s14 }
  0x33   : > { %1900 = vrot.lane.b32.xlu1 %v2473_v11, %s2381_s14 }
  0x36   : > { %1905 = vrot.lane.b32.xlu0 %v1824_v3, %s2382_s15 }
  0x37   : > { %1910 = vrot.lane.b32.xlu1 %v1829_v10, %s2382_s15 }
  0x3a   : > { %1915 = vrot.lane.b32.xlu0 %v1834_v7, %s2382_s15 }
  0x3b   : > { %1920 = vrot.lane.b32.xlu1 %v2473_v11, %s2382_s15 }
  0x3e   : > { %1925 = vrot.lane.b32.xlu0 %v1924_v12, %s2383_s16 }
  0x3f   : > { %1930 = vrot.lane.b32.xlu1 %v1929_v13, %s2383_s16 }
  0x42   : > { %1935 = vrot.lane.b32.xlu0 %v1934_v14, %s2383_s16 }
  0x43   : > { %1940 = vrot.lane.b32.xlu1 %v1939_v15, %s2383_s16 }
  0x46   : > { %1945 = vrot.lane.b32.xlu0 %v1924_v12, %s2384_s17 }
  0x47   : > { %1950 = vrot.lane.b32.xlu1 %v1929_v13, %s2384_s17 }
  0x4a   : > { %1955 = vrot.lane.b32.xlu0 %v1934_v14, %s2384_s17 }
  0x4b   : > { %1960 = vrot.lane.b32.xlu1 %v1939_v15, %s2384_s17 }
  0x4e   : > { %1965 = vrot.lane.b32.xlu0 %v1924_v12, %s2385_s18 }
  0x4f   : > { %1970 = vrot.lane.b32.xlu1 %v1929_v13, %s2385_s18 }
  0x52   : > { %1975 = vrot.lane.b32.xlu0 %v1934_v14, %s2385_s18 }
  0x53   : > { %1980 = vrot.lane.b32.xlu1 %v1939_v15, %s2385_s18 }
  0x56   : > { %1985 = vrot.lane.b32.xlu0 %v1824_v3, %s2386_s19 }
  0x57   : > { %1990 = vrot.lane.b32.xlu1 %v1989_v16, %s2386_s19 }
  0x5a   : > { %398 = vrot.lane.b32.xlu0 %v2507_v17, %s2378_s11 }
  0x5b   : > { %1995 = vrot.lane.b32.xlu1 %v1929_v13, %s2386_s19 }
  0x5e   : > { %594 = vrot.lane.b32.xlu0 %v2507_v17, %s2380_s13 }
  0x5f   : > { %503 = vrot.lane.b32.xlu1 %v2507_v17, %s2379_s12 }
  0x62   : > { %790 = vrot.lane.b32.xlu0 %v2507_v17, %s2382_s15 }
  0x63   : > { %699 = vrot.lane.b32.xlu1 %v2507_v17, %s2381_s14  ;;  %s1803_s14 = smul.u32 56, %s4210_s28 }
  0x66   : > { %986 = vrot.lane.b32.xlu0 %v2507_v17, %s2384_s17  ;;  %s305_s17 = scalar_lea.vmem %s3950_s8, %s1803_s14 }
  0x67   : > { %895 = vrot.lane.b32.xlu1 %v2507_v17, %s2383_s16 }
  0x6b   : > { %1091 = vrot.lane.b32.xlu1 %v2507_v17, %s2385_s18 }
  0x88   : > { %v1826_v19 = vpop.permute.xlu0 %1825 }
  0x89   : > { %v2526_v21 = vpop.permute.xlu1 %1835  ;;  %v1828_v22 = vunpack.i.h.bf16 %v1826_v19  ;;  %v1827_v23 = vunpack.i.l.bf16 %v1826_v19 }
  0x8a   : > { %v3952_v24 = vunpack.i.l.bf16 %v2526_v21  ;;  %v1838_v26 = vunpack.i.h.bf16 %v2526_v21 }
  0x8b   : > { %v2540_v32 = vsel %vm400_vm0, %v1827_v23, %v1828_v22 }
  0x8c   : > { %v1831_v25 = vpop.permute.xlu0 %1830  ;;  %v2550_v34 = vsel %vm400_vm0, %v3952_v24, %v1827_v23 }
  0x8d   : > { %v1833_v27 = vunpack.i.h.bf16 %v1831_v25  ;;  %v1832_v28 = vunpack.i.l.bf16 %v1831_v25  ;;  %v2531_v29 = vpop.permute.xlu1 %1840 }
  0x8e   : > { %v3961_v30 = vunpack.i.l.bf16 %v2531_v29 }
  0x8f   : > { %v2536_v31 = vsel %vm400_vm0, %v1828_v22, %v1832_v28  ;;  %v2544_v33 = vsel %vm400_vm0, %v1832_v28, %v1833_v27  ;;  %v2565_v42 = vsel %vm400_vm0, %v1833_v27, %v1838_v26 }
  0x90   : > { %v1846_v35 = vpop.permute.xlu0 %1845  ;;  %v1999_v36 = vpack.i.bf16 %v2536_v31, %v2540_v32  ;;  %v2004_v37 = vpack.i.bf16 %v2550_v34, %v2544_v33  ;;  %v2561_v41 = vsel %vm400_vm0, %v1838_v26, %v3961_v30  ;;  %4047 = vst [vmem:[#allocation4_spill] sm:$0xff] %v2565_v42 }
  0x91   : > { %v1848_v38 = vunpack.i.h.bf16 %v1846_v35  ;;  %v1847_v39 = vunpack.i.l.bf16 %v1846_v35  ;;  %v1851_v40 = vpop.permute.xlu1 %1850  ;;  %4046 = vst [vmem:[#allocation3_spill] sm:$0xff] %v2561_v41  ;;  %v2009_v46 = vpack.i.bf16 %v2561_v41, %v2565_v42 }
  0x92   : > { %v1853_v43 = vunpack.i.h.bf16 %v1851_v40  ;;  %v1852_v44 = vunpack.i.l.bf16 %v1851_v40  ;;  %2000 = vrot.lane.b32.xlu0 %v1999_v36, %s2386_s19  ;;  %2005 = vrot.lane.b32.xlu1 %v2004_v37, %s2386_s19 }
  0x93   : > { %v2575_v47 = vsel %vm505_vm1, %v1847_v39, %v1848_v38 }
  0x94   : > { %v2569_v45 = vpop.permute.xlu0 %1855  ;;  %v2583_v51 = vsel %vm505_vm1, %v1848_v38, %v1852_v44  ;;  %v2587_v52 = vsel %vm505_vm1, %v1852_v44, %v1853_v43 }
  0x95   : > { %v1858_v48 = vunpack.i.h.bf16 %v2569_v45  ;;  %v3959_v49 = vunpack.i.l.bf16 %v2569_v45  ;;  %v2579_v50 = vpop.permute.xlu1 %1860  ;;  %v2014_v56 = vpack.i.bf16 %v2583_v51, %v2575_v47 }
  0x96   : > { %v3955_v53 = vunpack.i.l.bf16 %v2579_v50  ;;  %2010 = vrot.lane.b32.xlu0 %v2009_v46, %s2386_s19 }
  0x97   : > { %v2595_v54 = vsel %vm505_vm1, %v3959_v49, %v1847_v39  ;;  %v2610_v62 = vsel %vm505_vm1, %v1853_v43, %v1858_v48 }
  0x98   : > { %v1866_v55 = vpop.permute.xlu0 %1865  ;;  %v2019_v57 = vpack.i.bf16 %v2595_v54, %v2587_v52  ;;  %v2606_v61 = vsel %vm505_vm1, %v1858_v48, %v3955_v53  ;;  %4049 = vst [vmem:[#allocation6_spill] sm:$0xff] %v2610_v62 }
  0x99   : > { %v1868_v58 = vunpack.i.h.bf16 %v1866_v55  ;;  %v1867_v59 = vunpack.i.l.bf16 %v1866_v55  ;;  %v1871_v60 = vpop.permute.xlu1 %1870  ;;  %4048 = vst [vmem:[#allocation5_spill] sm:$0xff] %v2606_v61  ;;  %v2024_v8 = vpack.i.bf16 %v2606_v61, %v2610_v62 }
  0x9a   : > { %v1873_v63 = vunpack.i.h.bf16 %v1871_v60  ;;  %v1872_v3 = vunpack.i.l.bf16 %v1871_v60  ;;  %2015 = vrot.lane.b32.xlu0 %v2014_v56, %s2386_s19  ;;  %2020 = vrot.lane.b32.xlu1 %v2019_v57, %s2386_s19 }
  0x9b   : > { %v2616_v4 = vsel %vm596_vm2, %v1867_v59, %v1868_v58 }
  0x9c   : > { %v2618_v6 = vpop.permute.xlu0 %1875  ;;  %v2622_v7 = vsel %vm596_vm2, %v1868_v58, %v1872_v3  ;;  %v2634_v14 = vsel %vm596_vm2, %v1872_v3, %v1873_v63 }
  0x9d   : > { %v1878_v9 = vunpack.i.h.bf16 %v2618_v6  ;;  %v3960_v10 = vunpack.i.l.bf16 %v2618_v6  ;;  %v2628_v12 = vpop.permute.xlu1 %1880  ;;  %v2029_v13 = vpack.i.bf16 %v2622_v7, %v2616_v4 }
  0x9e   : > { %v3958_v15 = vunpack.i.l.bf16 %v2628_v12  ;;  %2025 = vrot.lane.b32.xlu1 %v2024_v8, %s2386_s19 }
  0x9f   : > { %2030 = vrot.lane.b32.xlu0 %v2029_v13, %s2386_s19  ;;  %v2641_v16 = vsel %vm596_vm2, %v1873_v63, %v1878_v9  ;;  %v2647_v19 = vsel %vm596_vm2, %v3960_v10, %v1867_v59 }
  0xa0   : > { %4050 = vst [vmem:[#allocation7_spill] sm:$0xff] %v2641_v16  ;;  %v1886_v22 = vpop.permute.xlu0 %1885  ;;  %v2653_v23 = vsel %vm596_vm2, %v1878_v9, %v3958_v15  ;;  %v2034_v25 = vpack.i.bf16 %v2647_v19, %v2634_v14 }
  0xa1   : > { %4051 = vst [vmem:[#allocation8_spill] sm:$0xff] %v2653_v23  ;;  %v1888_v26 = vunpack.i.h.bf16 %v1886_v22  ;;  %v1887_v27 = vunpack.i.l.bf16 %v1886_v22  ;;  %v1891_v28 = vpop.permute.xlu1 %1890  ;;  %v2039_v35 = vpack.i.bf16 %v2653_v23, %v2641_v16 }
  0xa2   : > { %v1893_v36 = vunpack.i.h.bf16 %v1891_v28  ;;  %v1892_v37 = vunpack.i.l.bf16 %v1891_v28  ;;  %2035 = vrot.lane.b32.xlu1 %v2034_v25, %s2386_s19 }
  0xa3   : > { %2040 = vrot.lane.b32.xlu0 %v2039_v35, %s2386_s19  ;;  %v2664_v38 = vsel %vm701_vm3, %v1887_v27, %v1888_v26 }
  0xa4   : > { %v2666_v39 = vpop.permute.xlu0 %1895  ;;  %v2670_v40 = vsel %vm701_vm3, %v1888_v26, %v1892_v37  ;;  %v2680_v55 = vsel %vm701_vm3, %v1892_v37, %v1893_v36 }
  0xa5   : > { %v1898_v43 = vunpack.i.h.bf16 %v2666_v39  ;;  %v3956_v44 = vunpack.i.l.bf16 %v2666_v39  ;;  %v2674_v46 = vpop.permute.xlu1 %1900  ;;  %v2044_v48 = vpack.i.bf16 %v2670_v40, %v2664_v38 }
  0xa6   : > { %v3953_v56 = vunpack.i.l.bf16 %v2674_v46 }
  0xa7   : > { %2045 = vrot.lane.b32.xlu0 %v2044_v48, %s2386_s19  ;;  %v2688_v57 = vsel %vm701_vm3, %v3956_v44, %v1887_v27  ;;  %v2701_v9 = vsel %vm701_vm3, %v1893_v36, %v1898_v43 }
  0xa8   : > { %v1906_v58 = vpop.permute.xlu0 %1905  ;;  %v2049_v59 = vpack.i.bf16 %v2688_v57, %v2680_v55  ;;  %v2697_v8 = vsel %vm701_vm3, %v1898_v43, %v3953_v56  ;;  %4053 = vst [vmem:[#allocation10_spill] sm:$0xff] %v2701_v9 }
  0xa9   : > { %v1908_v60 = vunpack.i.h.bf16 %v1906_v58  ;;  %v1907_v63 = vunpack.i.l.bf16 %v1906_v58  ;;  %v1911_v3 = vpop.permute.xlu1 %1910  ;;  %4052 = vst [vmem:[#allocation9_spill] sm:$0xff] %v2697_v8  ;;  %v2054_v28 = vpack.i.bf16 %v2697_v8, %v2701_v9 }
  0xaa   : > { %v1913_v13 = vunpack.i.h.bf16 %v1911_v3  ;;  %v1912_v22 = vunpack.i.l.bf16 %v1911_v3  ;;  %2050 = vrot.lane.b32.xlu1 %v2049_v59, %s2386_s19 }
  0xab   : > { %v2706_v25 = vsel %vm792_vm4, %v1907_v63, %v1908_v60 }
  0xac   : > { %v2708_v26 = vpop.permute.xlu0 %1915  ;;  %v2712_v27 = vsel %vm792_vm4, %v1908_v60, %v1912_v22  ;;  %v2724_v48 = vsel %vm792_vm4, %v1912_v22, %v1913_v13 }
  0xad   : > { %v1918_v35 = vunpack.i.h.bf16 %v2708_v26  ;;  %v3957_v36 = vunpack.i.l.bf16 %v2708_v26  ;;  %v2718_v37 = vpop.permute.xlu1 %1920  ;;  %v2059_v43 = vpack.i.bf16 %v2712_v27, %v2706_v25 }
  0xae   : > { %v3954_v58 = vunpack.i.l.bf16 %v2718_v37  ;;  %2055 = vrot.lane.b32.xlu1 %v2054_v28, %s2386_s19 }
  0xaf   : > { %2060 = vrot.lane.b32.xlu0 %v2059_v43, %s2386_s19  ;;  %v2731_v59 = vsel %vm792_vm4, %v1913_v13, %v1918_v35  ;;  %v2737_v60 = vsel %vm792_vm4, %v3957_v36, %v1907_v63 }
  0xb0   : > { %4054 = vst [vmem:[#allocation11_spill] sm:$0xff] %v2731_v59  ;;  %v1926_v3 = vpop.permute.xlu0 %1925  ;;  %v2743_v22 = vsel %vm792_vm4, %v1918_v35, %v3954_v58  ;;  %v2064_v28 = vpack.i.bf16 %v2737_v60, %v2724_v48 }
  0xb1   : > { %4055 = vst [vmem:[#allocation12_spill] sm:$0xff] %v2743_v22  ;;  %v1928_v13 = vunpack.i.h.bf16 %v1926_v3  ;;  %v1927_v43 = vunpack.i.l.bf16 %v1926_v3  ;;  %v1931_v18 = vpop.permute.xlu1 %1930  ;;  %v2069_v24 = vpack.i.bf16 %v2743_v22, %v2731_v59 }
  0xb2   : > { %v1933_v63 = vunpack.i.h.bf16 %v1931_v18  ;;  %v1932_v56 = vunpack.i.l.bf16 %v1931_v18  ;;  %2065 = vrot.lane.b32.xlu1 %v2064_v28, %s2386_s19 }
  0xb3   : > { %2070 = vrot.lane.b32.xlu0 %v2069_v24, %s2386_s19  ;;  %v2754_v35 = vsel %vm897_vm5, %v1927_v43, %v1928_v13 }
  0xb4   : > { %4056 = vst [vmem:[#allocation13_spill] sm:$0xff] %v2754_v35  ;;  %v1936_v58 = vpop.permute.xlu0 %1935  ;;  %v2758_v53 = vsel %vm897_vm5, %v1928_v13, %v1932_v56  ;;  %v2766_v28 = vsel %vm897_vm5, %v1932_v56, %v1933_v63 }
  0xb5   : > { %4057 = vst [vmem:[#allocation14_spill] sm:$0xff] %v2758_v53  ;;  %v1938_v3 = vunpack.i.h.bf16 %v1936_v58  ;;  %v1937_v44 = vunpack.i.l.bf16 %v1936_v58  ;;  %v2760_v36 = vpop.permute.xlu1 %1940  ;;  %v2074_v18 = vpack.i.bf16 %v2758_v53, %v2754_v35  ;;  %4058 = vst [vmem:[#allocation15_spill] sm:$0xff] %v2766_v28 }
  0xb6   : > { %v3965_v24 = vunpack.i.h.bf16 %v2760_v36 }
  0xb7   : > { %2075 = vrot.lane.b32.xlu0 %v2074_v18, %s2386_s19  ;;  %v2773_v13 = vsel %vm897_vm5, %v1937_v44, %v1927_v43  ;;  %v4060_v18 = vunpack.i.l.bf16 %v2760_v36  ;;  %v2792_v59 = vsel %vm897_vm5, %v1933_v63, %v1938_v3 }
  0xb8   : > { %4059 = vst [vmem:[#allocation16_spill] sm:$0xff] %v2773_v13  ;;  %v1946_v58 = vpop.permute.xlu0 %1945  ;;  %v2079_v49 = vpack.i.bf16 %v2773_v13, %v2766_v28  ;;  %v2782_v56 = vsel %vm897_vm5, %v3965_v24, %v1937_v44  ;;  %4062 = vst [vmem:[#allocation18_spill] sm:$0xff] %v2792_v59 }
  0xb9   : > { %v1948_v10 = vunpack.i.h.bf16 %v1946_v58  ;;  %v1947_v30 = vunpack.i.l.bf16 %v1946_v58  ;;  %v1951_v15 = vpop.permute.xlu1 %1950  ;;  %v2788_v43 = vsel %vm897_vm5, %v1938_v3, %v4060_v18 }
  0xba   : > { %4061 = vst [vmem:[#allocation17_spill] sm:$0xff] %v2788_v43  ;;  %v1953_v22 = vunpack.i.h.bf16 %v1951_v15  ;;  %v1952_v9 = vunpack.i.l.bf16 %v1951_v15  ;;  %2080 = vrot.lane.b32.xlu1 %v2079_v49, %s2386_s19  ;;  %v2084_v18 = vpack.i.bf16 %v2788_v43, %v2792_v59 }
  0xbb   : > { %v2797_v44 = vsel %vm988_vm6, %v1947_v30, %v1948_v10 }
  0xbc   : > { %4063 = vst [vmem:[#allocation19_spill] sm:$0xff] %v2797_v44  ;;  %v1956_v58 = vpop.permute.xlu0 %1955  ;;  %v2801_v24 = vsel %vm988_vm6, %v1948_v10, %v1952_v9  ;;  %v2811_v49 = vsel %vm988_vm6, %v1952_v9, %v1953_v22 }
  0xbd   : > { %4064 = vst [vmem:[#allocation20_spill] sm:$0xff] %v2801_v24  ;;  %v1958_v8 = vunpack.i.h.bf16 %v1956_v58  ;;  %v1957_v16 = vunpack.i.l.bf16 %v1956_v58  ;;  %v2805_v63 = vpop.permute.xlu1 %1960  ;;  %v2089_v15 = vpack.i.bf16 %v2801_v24, %v2797_v44  ;;  %4065 = vst [vmem:[#allocation21_spill] sm:$0xff] %v2811_v49 }
  0xbe   : > { %v3975_v3 = vunpack.i.h.bf16 %v2805_v63  ;;  %v3973_v23 = vunpack.i.l.bf16 %v2805_v63  ;;  %2085 = vrot.lane.b32.xlu1 %v2084_v18, %s2386_s19 }
  0xbf   : > { %2090 = vrot.lane.b32.xlu0 %v2089_v15, %s2386_s19  ;;  %v2819_v10 = vsel %vm988_vm6, %v1953_v22, %v1958_v8  ;;  %v2823_v58 = vsel %vm988_vm6, %v1957_v16, %v1947_v30 }
  0xc0   : > { %4066 = vst [vmem:[#allocation22_spill] sm:$0xff] %v2819_v10  ;;  %4067 = vst [vmem:[#allocation23_spill] sm:$0xff] %v2823_v58  ;;  %v1966_v59 = vpop.permute.xlu0 %1965  ;;  %v2829_v9 = vsel %vm988_vm6, %v1958_v8, %v3973_v23  ;;  %v2094_v18 = vpack.i.bf16 %v2823_v58, %v2811_v49  ;;  %v2838_v22 = vsel %vm988_vm6, %v3975_v3, %v1957_v16 }
  0xc1   : > { %4068 = vst [vmem:[#allocation24_spill] sm:$0xff] %v2829_v9  ;;  %v1968_v30 = vunpack.i.h.bf16 %v1966_v59  ;;  %v1967_v15 = vunpack.i.l.bf16 %v1966_v59  ;;  %v1971_v43 = vpop.permute.xlu1 %1970  ;;  %v2099_v62 = vpack.i.bf16 %v2829_v9, %v2819_v10 }
  0xc2   : > { %v1973_v61 = vunpack.i.h.bf16 %v1971_v43  ;;  %v1972_v8 = vunpack.i.l.bf16 %v1971_v43  ;;  %2095 = vrot.lane.b32.xlu1 %v2094_v18, %s2386_s19 }
  0xc3   : > { %2100 = vrot.lane.b32.xlu0 %v2099_v62, %s2386_s19  ;;  %v2846_v23 = vsel %vm1093_vm7, %v1967_v15, %v1968_v30 }
  0xc4   : > { %4069 = vst [vmem:[#allocation25_spill] sm:$0xff] %v2846_v23  ;;  %v1976_v42 = vpop.permute.xlu0 %1975  ;;  %v2850_v16 = vsel %vm1093_vm7, %v1968_v30, %v1972_v8  ;;  %v2858_v18 = vsel %vm1093_vm7, %v1972_v8, %v1973_v61 }
  0xc5   : > { %4070 = vst [vmem:[#allocation26_spill] sm:$0xff] %v2850_v16  ;;  %v1978_v59 = vunpack.i.h.bf16 %v1976_v42  ;;  %v1977_v3 = vunpack.i.l.bf16 %v1976_v42  ;;  %v2852_v41 = vpop.permute.xlu1 %1980  ;;  %v2104_v43 = vpack.i.bf16 %v2850_v16, %v2846_v23  ;;  %4071 = vst [vmem:[#allocation27_spill] sm:$0xff] %v2858_v18 }
  0xc6   : > { %v3984_v62 = vunpack.i.h.bf16 %v2852_v41  ;;  %v3985_v10 = vunpack.i.l.bf16 %v2852_v41 }
  0xc7   : > { %2105 = vrot.lane.b32.xlu0 %v2104_v43, %s2386_s19  ;;  %v2865_v30 = vsel %vm1093_vm7, %v1973_v61, %v1978_v59  ;;  %v2869_v42 = vsel %vm1093_vm7, %v1977_v3, %v1967_v15 }
  0xc8   : > { %4072 = vst [vmem:[#allocation28_spill] sm:$0xff] %v2865_v30  ;;  %4073 = vst [vmem:[#allocation29_spill] sm:$0xff] %v2869_v42  ;;  %v2876_v8 = vsel %vm1093_vm7, %v3984_v62, %v1977_v3  ;;  %v1986_v9 = vpop.permute.xlu0 %1985  ;;  %v2882_v43 = vsel %vm1093_vm7, %v1978_v59, %v3985_v10  ;;  %v2109_v61 = vpack.i.bf16 %v2869_v42, %v2858_v18  ;;  %v1843_v3 = vunpack.i.h.bf16 %v2531_v29 }
  0xc9   : > { %4074 = vst [vmem:[#allocation30_spill] sm:$0xff] %v2882_v43  ;;  %v1988_v15 = vunpack.i.h.bf16 %v1986_v9  ;;  %v1987_v16 = vunpack.i.l.bf16 %v1986_v9  ;;  %v1991_v23 = vpop.permute.xlu1 %1990  ;;  %v2114_v24 = vpack.i.bf16 %v2882_v43, %v2865_v30 }
  0xca   : > { %v1993_v49 = vunpack.i.h.bf16 %v1991_v23  ;;  %v1992_v58 = vunpack.i.l.bf16 %v1991_v23  ;;  %2110 = vrot.lane.b32.xlu1 %v2109_v61, %s2386_s19 }
  0xcb   : > { %2115 = vrot.lane.b32.xlu0 %v2114_v24, %s2386_s19  ;;  %v343_v59 = vsel %vm336_vm8, %v1987_v16, %v1988_v15 }
  0xcc   : > { %v2893_v62 = vpop.permute.xlu0 %398  ;;  %v2124_v10 = vpack.i.bf16 %v343_v59, %v2507_v17  ;;  %v342_v9 = vsel %vm336_vm8, %v1988_v15, %v1992_v58  ;;  %v344_v30 = vsel %vm336_vm8, %v1993_v49, %v1987_v16  ;;  %v346_v23 = vpack.c.bf16 %v343_v59, %v2452_v0 }
  0xcd   : > { %v2901_v61 = vpop.permute.xlu1 %1995  ;;  %v345_v43 = vpack.c.bf16 %v344_v30, %v2458_v2  ;;  %v401_v24 = vsel %vm400_vm0, %v1843_v3, %v2893_v62  ;;  %v2129_v15 = vpack.i.bf16 %v344_v30, %v342_v9  ;;  %v1883_v0 = vunpack.i.h.bf16 %v2628_v12 }
  0xce   : > { %v3989_v42 = vunpack.i.h.bf16 %v2901_v61  ;;  %v1997_v17 = vunpack.i.l.bf16 %v2901_v61  ;;  %2120 = vrot.lane.b32.xlu1 %v2473_v11, %s2386_s19  ;;  %1295 = vmatprep.subr.bf16.mxu0 %v346_v23  ;;  %v4075_v2 = vunpack.i.l.bf16 %v2531_v29  ;;  %v4078_v30 = vunpack.i.l.bf16 %v2618_v6 }
  0xcf   : > { %2125 = vrot.lane.b32.xlu0 %v2124_v10, %s2386_s19  ;;  %1296 = vmatpush1.bf16.msra.mxu0 %v345_v43 }
  0xd0   : > { %v2917_v49 = vsel %vm400_vm0, %v4075_v2, %v1843_v3  ;;  %v595_v16 = vpop.permute.xlu0 %594  ;;  %v2923_v59 = vsel %vm336_vm8, %v1997_v17, %v3989_v42  ;;  %v341_v11 = vsel %vm336_vm8, %v1992_v58, %v1997_v17  ;;  %v347_v3 = vpack.c.bf16 %v342_v9, %v2455_v1 }
  0xd1   : > { %4076 = vst [vmem:[#allocation31_spill] sm:$0xff] %v2917_v49  ;;  %4077 = vst [vmem:[#allocation32_spill] sm:$0xff] %v2923_v59  ;;  %v2134_v10 = vpack.i.bf16 %v401_v24, %v2917_v49  ;;  %v2932_v29 = vsel %vm596_vm2, %v595_v16, %v4078_v30  ;;  %v504_v43 = vpop.permute.xlu1 %503  ;;  %v597_v23 = vsel %vm596_vm2, %v1883_v0, %v595_v16  ;;  %v4079_v2 = vunpack.i.l.bf16 %v2569_v45 }
  0xd2   : > { %2130 = vrot.lane.b32.xlu1 %v2129_v15, %s2386_s19  ;;  %v2139_v6 = vpack.i.bf16 %v2923_v59, %v341_v11  ;;  %v348_v58 = vpack.c.bf16 %v341_v11, %v2464_v5  ;;  %v1863_v24 = vunpack.i.h.bf16 %v2579_v50  ;;  %v1923_v1 = vunpack.i.h.bf16 %v2718_v37 }
  0xd3   : > { %v2941_v42 = vsel %vm505_vm1, %v504_v43, %v4079_v2  ;;  %2135 = vrot.lane.b32.xlu0 %v2134_v10, %s2386_s19  ;;  %v4080_v9 = vunpack.i.l.bf16 %v2628_v12  ;;  %v4082_v5 = vunpack.i.l.bf16 %v2708_v26  ;;  %v4084_v26 = vunpack.i.l.bf16 %v2579_v50 }
  0xd4   : > { %v791_v17 = vpop.permute.xlu0 %790  ;;  %1336 = vmatprep.subr.bf16.mxu1 %v348_v58  ;;  %v506_v16 = vsel %vm505_vm1, %v1863_v24, %v504_v43  ;;  %v1903_v43 = vunpack.i.h.bf16 %v2674_v46 }
  0xd5   : > { %v2953_v45 = vsel %vm596_vm2, %v4080_v9, %v1883_v0  ;;  %v2962_v11 = vsel %vm792_vm4, %v791_v17, %v4082_v5  ;;  %v700_v10 = vpop.permute.xlu1 %699  ;;  %1337 = vmatpush1.bf16.msra.mxu1 %v347_v3  ;;  %v793_v12 = vsel %vm792_vm4, %v1923_v1, %v791_v17  ;;  %v4083_v0 = vunpack.i.l.bf16 %v2666_v39 }
  0xd6   : > { %4081 = vst [vmem:[#allocation33_spill] sm:$0xff] %v2953_v45  ;;  %v2149_v15 = vpack.i.bf16 %v597_v23, %v2953_v45  ;;  %2140 = vrot.lane.b32.xlu1 %v2139_v6, %s2386_s19  ;;  %v2978_v23 = vsel %vm505_vm1, %v4084_v26, %v1863_v24  ;;  %v4086_v39 = vunpack.i.l.bf16 %v2718_v37  ;;  %v702_v50 = vsel %vm701_vm3, %v1903_v43, %v700_v10 }
  0xd7   : > { %v2970_v30 = vsel %vm701_vm3, %v700_v10, %v4083_v0  ;;  %4085 = vst [vmem:[#allocation34_spill] sm:$0xff] %v2978_v23  ;;  %v2144_v3 = vpack.i.bf16 %v506_v16, %v2978_v23  ;;  %v4088_v24 = vunpack.i.l.bf16 %v2805_v63  ;;  %v4095_v0 = vunpack.i.h.bf16 %v2760_v36 }
  0xd8   : > { %2150 = vrot.lane.b32.xlu0 %v2149_v15, %s2386_s19  ;;  %v2986_v2 = vsel %vm792_vm4, %v4086_v39, %v1923_v1  ;;  %v987_v58 = vpop.permute.xlu0 %986  ;;  %v4090_v15 = vunpack.i.h.bf16 %v2805_v63  ;;  %v4091_v1 = vunpack.i.l.bf16 %v2674_v46  ;;  %v4098_v39 = vunpack.i.h.bf16 %v2852_v41 }
  0xd9   : > { %4087 = vst [vmem:[#allocation35_spill] sm:$0xff] %v2986_v2  ;;  %v2159_v6 = vpack.i.bf16 %v793_v12, %v2986_v2  ;;  %v896_v9 = vpop.permute.xlu1 %895  ;;  %v2995_v17 = vsel %vm988_vm6, %v4088_v24, %v987_v58  ;;  %v4093_v12 = vunpack.i.l.bf16 %v2760_v36  ;;  %vm2389_vm2 = vmmov 0  }
  0xda   : > { %4089 = vst [vmem:[#allocation36_spill] sm:$0xff] %v2995_v17  ;;  %v997_v37 = vsel %vm988_vm6, %v987_v58, %v4090_v15  ;;  %2145 = vrot.lane.b32.xlu1 %v2144_v3, %s2386_s19  ;;  %v3006_v16 = vsel %vm701_vm3, %v4091_v1, %v1903_v43  ;;  %v906_v46 = vsel %vm897_vm5, %v896_v9, %v4095_v0  ;;  %v4096_v43 = vunpack.i.l.bf16 %v2852_v41 }
  0xdb   : > { %4092 = vst [vmem:[#allocation37_spill] sm:$0xff] %v3006_v16  ;;  %v2154_v5 = vpack.i.bf16 %v702_v50, %v3006_v16  ;;  %v2169_v10 = vpack.i.bf16 %v997_v37, %v2995_v17  ;;  %v3015_v63 = vsel %vm897_vm5, %v4093_v12, %v896_v9  ;;  %v4099_v1 = vunpack.i.l.bf16 %v2526_v21 }
  0xdc   : > { %2160 = vrot.lane.b32.xlu0 %v2159_v6, %s2386_s19  ;;  %4094 = vst [vmem:[#allocation38_spill] sm:$0xff] %v3015_v63  ;;  %v2164_v36 = vpack.i.bf16 %v906_v46, %v3015_v63  ;;  %vm1527_vm3 = vcmp.eq.s32.totalorder %v2524_v20, 0  ;;  %vm1536_vm4 = vcmask 64512   ;;  %vm1691_vm5 = vcmask 15360  }
  0xdd   : > { %v1092_v26 = vpop.permute.xlu1 %1091  ;;  %v409_v41 = vsel %vm400_vm0, %v2893_v62, %v4099_v1 }
  0xde   : > { %2155 = vrot.lane.b32.xlu1 %v2154_v5, %s2386_s19  ;;  %v3026_v3 = vsel %vm1093_vm7, %v4096_v43, %v1092_v26  ;;  %v3032_v58 = vsel %vm1093_vm7, %v1092_v26, %v4098_v39 }
  0xdf   : > { %4097 = vst [vmem:[#allocation39_spill] sm:$0xff] %v3026_v3 }
  0xe0   : > { %2170 = vrot.lane.b32.xlu0 %v2169_v10, %s2386_s19 }
  0xe2   : > { %2165 = vrot.lane.b32.xlu1 %v2164_v36, %s2386_s19 }
 0x104   : > { %v2001_v6 = vpop.permute.xlu0 %2000  ;;  %v2006_v50 = vpop.permute.xlu1 %2005 }
 0x105   : > { %v2003_v9 = vunpack.i.h.bf16 %v2001_v6  ;;  %v2002_v24 = vunpack.i.l.bf16 %v2001_v6  ;;  %v2008_v15 = vunpack.i.h.bf16 %v2006_v50  ;;  %v2007_v37 = vunpack.i.l.bf16 %v2006_v50 }
 0x107   : > { %v3044_v5 = vsel %vm336_vm8, %v2002_v24, %v2003_v9  ;;  %v3048_v10 = vsel %vm336_vm8, %v2003_v9, %v2007_v37  ;;  %v3052_v12 = vsel %vm336_vm8, %v2008_v15, %v2002_v24 }
 0x108   : > { %v3054_v0 = vpop.permute.xlu0 %2010  ;;  %v2174_v21 = vpack.i.bf16 %v3044_v5, %v409_v41  ;;  %v2179_v46 = vpack.i.bf16 %v3052_v12, %v3048_v10 }
 0x109   : > { %v3990_v62 = vunpack.i.h.bf16 %v3054_v0  ;;  %v2012_v26 = vunpack.i.l.bf16 %v3054_v0 }
 0x10a   : > { %2175 = vrot.lane.b32.xlu0 %v2174_v21, %s2386_s19  ;;  %2180 = vrot.lane.b32.xlu1 %v2179_v46, %s2386_s19 }
 0x10b   : > { %v3067_v43 = vsel %vm336_vm8, %v2012_v26, %v3990_v62  ;;  %v3071_v39 = vsel %vm336_vm8, %v2007_v37, %v2012_v26 }
 0x10c   : > { %4100 = vst [vmem:[#allocation40_spill] sm:$0xff] %v3067_v43  ;;  %v2016_v36 = vpop.permute.xlu0 %2015  ;;  %v2021_v6 = vpop.permute.xlu1 %2020  ;;  %v2184_v50 = vpack.i.bf16 %v3067_v43, %v3071_v39 }
 0x10d   : > { %v2018_v9 = vunpack.i.h.bf16 %v2016_v36  ;;  %v2017_v24 = vunpack.i.l.bf16 %v2016_v36  ;;  %v2023_v15 = vunpack.i.h.bf16 %v2021_v6  ;;  %v2022_v1 = vunpack.i.l.bf16 %v2021_v6 }
 0x10e   : > { %2185 = vrot.lane.b32.xlu0 %v2184_v50, %s2386_s19 }
 0x10f   : > { %v3078_v41 = vsel %vm336_vm8, %v2018_v9, %v2022_v1  ;;  %v3082_v21 = vsel %vm336_vm8, %v2023_v15, %v2017_v24  ;;  %v3086_v37 = vsel %vm336_vm8, %v2017_v24, %v2018_v9 }
 0x110   : > { %v3088_v46 = vpop.permute.xlu1 %2025  ;;  %v2194_v26 = vpack.i.bf16 %v3082_v21, %v3078_v41  ;;  %v2189_v36 = vpack.i.bf16 %v3086_v37, %v2941_v42 }
 0x111   : > { %v2031_v6 = vpop.permute.xlu0 %2030  ;;  %v3994_v50 = vunpack.i.h.bf16 %v3088_v46  ;;  %v2027_v62 = vunpack.i.l.bf16 %v3088_v46 }
 0x112   : > { %v2033_v17 = vunpack.i.h.bf16 %v2031_v6  ;;  %v2032_v15 = vunpack.i.l.bf16 %v2031_v6  ;;  %2195 = vrot.lane.b32.xlu1 %v2194_v26, %s2386_s19  ;;  %2190 = vrot.lane.b32.xlu0 %v2189_v36, %s2386_s19 }
 0x113   : > { %v3102_v9 = vsel %vm336_vm8, %v2027_v62, %v3994_v50  ;;  %v3106_v42 = vsel %vm336_vm8, %v2022_v1, %v2027_v62 }
 0x114   : > { %4101 = vst [vmem:[#allocation41_spill] sm:$0xff] %v3102_v9  ;;  %v2036_v24 = vpop.permute.xlu1 %2035  ;;  %v2199_v63 = vpack.i.bf16 %v3102_v9, %v3106_v42  ;;  %v3112_v6 = vsel %vm336_vm8, %v2032_v15, %v2033_v17 }
 0x115   : > { %v3114_v26 = vpop.permute.xlu0 %2040  ;;  %v2038_v36 = vunpack.i.h.bf16 %v2036_v24  ;;  %v2037_v2 = vunpack.i.l.bf16 %v2036_v24  ;;  %v2204_v50 = vpack.i.bf16 %v3112_v6, %v2932_v29 }
 0x116   : > { %v3999_v16 = vunpack.i.h.bf16 %v3114_v26  ;;  %v2042_v62 = vunpack.i.l.bf16 %v3114_v26  ;;  %2200 = vrot.lane.b32.xlu1 %v2199_v63, %s2386_s19 }
 0x117   : > { %2205 = vrot.lane.b32.xlu0 %v2204_v50, %s2386_s19  ;;  %v3124_v1 = vsel %vm336_vm8, %v2033_v17, %v2037_v2  ;;  %v3128_v45 = vsel %vm336_vm8, %v2038_v36, %v2032_v15 }
 0x118   : > { %v2209_v24 = vpack.i.bf16 %v3128_v45, %v3124_v1  ;;  %v3136_v29 = vsel %vm336_vm8, %v2042_v62, %v3999_v16  ;;  %v3140_v63 = vsel %vm336_vm8, %v2037_v2, %v2042_v62 }
 0x119   : > { %4102 = vst [vmem:[#allocation42_spill] sm:$0xff] %v3136_v29  ;;  %v2046_v50 = vpop.permute.xlu0 %2045  ;;  %v2214_v17 = vpack.i.bf16 %v3136_v29, %v3140_v63 }
 0x11a   : > { %v2048_v23 = vunpack.i.h.bf16 %v2046_v50  ;;  %v2047_v15 = vunpack.i.l.bf16 %v2046_v50  ;;  %2210 = vrot.lane.b32.xlu1 %v2209_v24, %s2386_s19 }
 0x11b   : > { %2215 = vrot.lane.b32.xlu0 %v2214_v17, %s2386_s19 }
 0x11c   : > { %v2051_v36 = vpop.permute.xlu1 %2050  ;;  %v3148_v9 = vsel %vm336_vm8, %v2047_v15, %v2048_v23 }
 0x11d   : > { %v2053_v16 = vunpack.i.h.bf16 %v2051_v36  ;;  %v2052_v43 = vunpack.i.l.bf16 %v2051_v36  ;;  %v2219_v2 = vpack.i.bf16 %v3148_v9, %v2970_v30 }
 0x11f   : > { %2220 = vrot.lane.b32.xlu0 %v2219_v2, %s2386_s19  ;;  %v3155_v62 = vsel %vm336_vm8, %v2048_v23, %v2052_v43  ;;  %v3159_v24 = vsel %vm336_vm8, %v2053_v16, %v2047_v15 }
 0x120   : > { %v3161_v50 = vpop.permute.xlu1 %2055  ;;  %v2224_v17 = vpack.i.bf16 %v3159_v24, %v3155_v62 }
 0x121   : > { %v2061_v29 = vpop.permute.xlu0 %2060  ;;  %v4006_v36 = vunpack.i.h.bf16 %v3161_v50  ;;  %v2057_v30 = vunpack.i.l.bf16 %v3161_v50 }
 0x122   : > { %v2063_v49 = vunpack.i.h.bf16 %v2061_v29  ;;  %v2062_v2 = vunpack.i.l.bf16 %v2061_v29  ;;  %2225 = vrot.lane.b32.xlu1 %v2224_v17, %s2386_s19 }
 0x123   : > { %v3172_v23 = vsel %vm336_vm8, %v2057_v30, %v4006_v36  ;;  %v3176_v16 = vsel %vm336_vm8, %v2052_v43, %v2057_v30 }
 0x124   : > { %4103 = vst [vmem:[#allocation43_spill] sm:$0xff] %v3172_v23  ;;  %v2066_v15 = vpop.permute.xlu1 %2065  ;;  %v2229_v59 = vpack.i.bf16 %v3172_v23, %v3176_v16  ;;  %v3182_v18 = vsel %vm336_vm8, %v2062_v2, %v2063_v49 }
 0x125   : > { %v3184_v29 = vpop.permute.xlu0 %2070  ;;  %v2068_v17 = vunpack.i.h.bf16 %v2066_v15  ;;  %v2067_v44 = vunpack.i.l.bf16 %v2066_v15  ;;  %v2234_v36 = vpack.i.bf16 %v3182_v18, %v2962_v11 }
 0x126   : > { %v4011_v53 = vunpack.i.h.bf16 %v3184_v29  ;;  %v2072_v43 = vunpack.i.l.bf16 %v3184_v29  ;;  %2230 = vrot.lane.b32.xlu1 %v2229_v59, %s2386_s19 }
 0x127   : > { %2235 = vrot.lane.b32.xlu0 %v2234_v36, %s2386_s19  ;;  %v3194_v30 = vsel %vm336_vm8, %v2063_v49, %v2067_v44  ;;  %v3198_v23 = vsel %vm336_vm8, %v2068_v17, %v2062_v2 }
 0x128   : > { %4104 = vst [vmem:[#allocation44_spill] sm:$0xff] %v3194_v30  ;;  %v2239_v15 = vpack.i.bf16 %v3198_v23, %v3194_v30  ;;  %v3206_v11 = vsel %vm336_vm8, %v2072_v43, %v4011_v53  ;;  %v3210_v59 = vsel %vm336_vm8, %v2067_v44, %v2072_v43 }
 0x129   : > { %4105 = vst [vmem:[#allocation45_spill] sm:$0xff] %v3206_v11  ;;  %4106 = vst [vmem:[#allocation46_spill] sm:$0xff] %v3210_v59  ;;  %v2076_v36 = vpop.permute.xlu0 %2075  ;;  %v2244_v49 = vpack.i.bf16 %v3206_v11, %v3210_v59 }
 0x12a   : > { %v2078_v13 = vunpack.i.h.bf16 %v2076_v36  ;;  %v2077_v2 = vunpack.i.l.bf16 %v2076_v36  ;;  %2240 = vrot.lane.b32.xlu1 %v2239_v15, %s2386_s19 }
 0x12b   : > { %2245 = vrot.lane.b32.xlu0 %v2244_v49, %s2386_s19 }
 0x12c   : > { %v2081_v17 = vpop.permute.xlu1 %2080  ;;  %v3218_v28 = vsel %vm336_vm8, %v2077_v2, %v2078_v13 }
 0x12d   : > { %4107 = vst [vmem:[#allocation47_spill] sm:$0xff] %v3218_v28  ;;  %v2083_v53 = vunpack.i.h.bf16 %v2081_v17  ;;  %v2082_v35 = vunpack.i.l.bf16 %v2081_v17  ;;  %v2249_v44 = vpack.i.bf16 %v3218_v28, %v2782_v56 }
 0x12f   : > { %2250 = vrot.lane.b32.xlu0 %v2249_v44, %s2386_s19  ;;  %v3225_v43 = vsel %vm336_vm8, %v2078_v13, %v2082_v35  ;;  %v3229_v15 = vsel %vm336_vm8, %v2083_v53, %v2077_v2 }
 0x130   : > { %4108 = vst [vmem:[#allocation48_spill] sm:$0xff] %v3225_v43  ;;  %4109 = vst [vmem:[#allocation49_spill] sm:$0xff] %v3229_v15  ;;  %v3231_v36 = vpop.permute.xlu1 %2085  ;;  %v2254_v49 = vpack.i.bf16 %v3229_v15, %v3225_v43 }
 0x131   : > { %v2091_v11 = vpop.permute.xlu0 %2090  ;;  %v4018_v17 = vunpack.i.h.bf16 %v3231_v36  ;;  %v2087_v56 = vunpack.i.l.bf16 %v3231_v36 }
 0x132   : > { %v2093_v28 = vunpack.i.h.bf16 %v2091_v11  ;;  %v2092_v44 = vunpack.i.l.bf16 %v2091_v11  ;;  %2255 = vrot.lane.b32.xlu1 %v2254_v49, %s2386_s19 }
 0x133   : > { %v3242_v53 = vsel %vm336_vm8, %v2087_v56, %v4018_v17  ;;  %v3246_v13 = vsel %vm336_vm8, %v2082_v35, %v2087_v56 }
 0x134   : > { %4110 = vst [vmem:[#allocation50_spill] sm:$0xff] %v3242_v53  ;;  %v2096_v2 = vpop.permute.xlu1 %2095  ;;  %v2259_v43 = vpack.i.bf16 %v3242_v53, %v3246_v13  ;;  %v3252_v15 = vsel %vm336_vm8, %v2092_v44, %v2093_v28 }
 0x135   : > { %4111 = vst [vmem:[#allocation51_spill] sm:$0xff] %v3252_v15  ;;  %v3254_v11 = vpop.permute.xlu0 %2100  ;;  %v2098_v49 = vunpack.i.h.bf16 %v2096_v2  ;;  %v2097_v30 = vunpack.i.l.bf16 %v2096_v2  ;;  %v2264_v17 = vpack.i.bf16 %v3252_v15, %v2838_v22 }
 0x136   : > { %v4022_v59 = vunpack.i.h.bf16 %v3254_v11  ;;  %v2102_v35 = vunpack.i.l.bf16 %v3254_v11  ;;  %2260 = vrot.lane.b32.xlu1 %v2259_v43, %s2386_s19 }
 0x137   : > { %2265 = vrot.lane.b32.xlu0 %v2264_v17, %s2386_s19  ;;  %v3264_v56 = vsel %vm336_vm8, %v2093_v28, %v2097_v30  ;;  %v3268_v53 = vsel %vm336_vm8, %v2098_v49, %v2092_v44  ;;  %v2274_v49 = vpack.i.bf16 %v3032_v58, %v3026_v3 }
 0x138   : > { %4112 = vst [vmem:[#allocation52_spill] sm:$0xff] %v3264_v56  ;;  %4113 = vst [vmem:[#allocation53_spill] sm:$0xff] %v3268_v53  ;;  %v3274_v22 = vsel %vm336_vm8, %v2102_v35, %v4022_v59  ;;  %v3278_v2 = vsel %vm336_vm8, %v2097_v30, %v2102_v35  ;;  %v2269_v43 = vpack.i.bf16 %v3268_v53, %v3264_v56 }
 0x139   : > { %4114 = vst [vmem:[#allocation54_spill] sm:$0xff] %v3274_v22  ;;  %4115 = vst [vmem:[#allocation55_spill] sm:$0xff] %v3278_v2  ;;  %v2279_v28 = vpack.i.bf16 %v3274_v22, %v3278_v2  ;;  %v2106_v17 = vpop.permute.xlu0 %2105 }
 0x13a   : > { %v2108_v15 = vunpack.i.h.bf16 %v2106_v17  ;;  %v2107_v44 = vunpack.i.l.bf16 %v2106_v17  ;;  %2270 = vrot.lane.b32.xlu1 %v2269_v43, %s2386_s19  ;;  %v3299_v43 = vld [vmem:[%s3943_s1] sm:$0xff] }
 0x13b   : > { %2280 = vrot.lane.b32.xlu0 %v2279_v28, %s2386_s19  ;;  %4118 = vst [vmem:[#allocation58_spill] sm:$0xff] %v3299_v43  ;;  %v3306_v17 = vcombine.high %v3299_v43, %v3299_v43 }
 0x13c   : > { %v3290_v30 = vsel %vm336_vm8, %v2107_v44, %v2108_v15  ;;  %v2111_v35 = vpop.permute.xlu1 %2110 }
 0x13d   : > { %4116 = vst [vmem:[#allocation56_spill] sm:$0xff] %v3290_v30  ;;  %v2284_v59 = vpack.i.bf16 %v3290_v30, %v2876_v8  ;;  %v3294_v56 = vpop.permute.xlu0 %2115  ;;  %v2113_v22 = vunpack.i.h.bf16 %v2111_v35  ;;  %v2112_v2 = vunpack.i.l.bf16 %v2111_v35  ;;  %4119 = vst [vmem:[#allocation59_spill] sm:$0xff] %v3306_v17  ;;  %1779 = vmatprep.mubr.msk.bf16.mxu0 %vm1291_vm9, %v3306_v17  ;;  %1780 = vmatprep.mubr.msk.bf16.mxu1 %vm1291_vm9, %v3306_v17 }
 0x13e   : > { %4117 = vst [vmem:[#allocation57_spill] sm:$0xff] %v3294_v56  ;;  %v4029_v28 = vunpack.i.h.bf16 %v3294_v56  ;;  %v2117_v58 = vunpack.i.l.bf16 %v3294_v56  ;;  %2275 = vrot.lane.b32.xlu1 %v2274_v49, %s2386_s19 }
 0x13f   : > { %v3310_v8 = vsel %vm336_vm8, %v2113_v22, %v2107_v44  ;;  %v3314_v35 = vsel %vm336_vm8, %v2108_v15, %v2112_v2  ;;  %2285 = vrot.lane.b32.xlu0 %v2284_v59, %s2386_s19 }
 0x140   : > { %4120 = vst [vmem:[#allocation60_spill] sm:$0xff] %v3310_v8  ;;  %4121 = vst [vmem:[#allocation61_spill] sm:$0xff] %v3314_v35  ;;  %v3321_v49 = vsel %vm336_vm8, %v2117_v58, %v4029_v28  ;;  %v2289_v3 = vpack.i.bf16 %v3310_v8, %v3314_v35  ;;  %v3327_v22 = vsel %vm336_vm8, %v2112_v2, %v2117_v58  ;;  %v2121_v44 = vpop.permute.xlu1 %2120  ;;  %v4038_v28 = vmov 0  }
 0x141   : > { %4122 = vst [vmem:[#allocation62_spill] sm:$0xff] %v3321_v49  ;;  %4123 = vst [vmem:[#allocation63_spill] sm:$0xff] %v3327_v22  ;;  %v2294_v59 = vpack.i.bf16 %v3321_v49, %v3327_v22  ;;  %v2126_v15 = vpop.permute.xlu0 %2125  ;;  %v2123_v43 = vunpack.i.h.bf16 %v2121_v44  ;;  %v2122_v56 = vunpack.i.l.bf16 %v2121_v44  ;;  %2359 = vset.pattern.permute.xlu0 %v4038_v28  ;;  %v4125_v8 = vunpack.i.h.bf16 %v2901_v61  ;;  %2360 = vset.pattern.permute.xlu1 %v4038_v28 }
 0x142   : > { %v2127_v35 = vunpack.i.l.bf16 %v2126_v15  ;;  %2290 = vrot.lane.b32.xlu1 %v2289_v3, %s2386_s19  ;;  %v2128_v2 = vunpack.i.h.bf16 %v2126_v15 }
 0x143   : > { %v3339_v58 = vsel %vm336_vm8, %v2122_v56, %v2123_v43  ;;  %v3345_v49 = vsel %vm336_vm8, %v4125_v8, %v2122_v56  ;;  %2295 = vrot.lane.b32.xlu0 %v2294_v59, %s2386_s19  ;;  %v4127_v59 = vunpack.i.h.bf16 %v3054_v0 }
 0x144   : > { %4124 = vst [vmem:[#allocation64_spill] sm:$0xff] %v3339_v58  ;;  %4126 = vst [vmem:[#allocation65_spill] sm:$0xff] %v3345_v49  ;;  %v2299_v44 = vpack.i.bf16 %v3339_v58, %v3345_v49  ;;  %v2131_v17 = vpop.permute.xlu1 %2130  ;;  %v337_v30 = vsel %vm336_vm8, %v2123_v43, %v2127_v35 }
 0x145   : > { %v2136_v3 = vpop.permute.xlu0 %2135  ;;  %v2133_v15 = vunpack.i.h.bf16 %v2131_v17  ;;  %v2132_v22 = vunpack.i.l.bf16 %v2131_v17 }
 0x146   : > { %v2138_v53 = vunpack.i.h.bf16 %v2136_v3  ;;  %v2137_v61 = vunpack.i.l.bf16 %v2136_v3  ;;  %2300 = vrot.lane.b32.xlu1 %v2299_v44, %s2386_s19 }
 0x147   : > { %v380_v56 = vsel %vm336_vm8, %v2128_v2, %v2132_v22  ;;  %v381_v8 = vsel %vm336_vm8, %v2133_v15, %v2128_v2 }
 0x148   : > { %v3362_v28 = vsel %vm336_vm8, %v4127_v59, %v2137_v61  ;;  %v3364_v17 = vpop.permute.xlu1 %2140  ;;  %v411_v43 = vpack.c.bf16 %v2540_v32, %v380_v56  ;;  %v410_v35 = vpack.c.bf16 %v2550_v34, %v381_v8  ;;  %v3373_v2 = vsel %vm336_vm8, %v2137_v61, %v2138_v53 }
 0x149   : > { %4128 = vst [vmem:[#allocation66_spill] sm:$0xff] %v3362_v28  ;;  %4129 = vst [vmem:[#allocation67_spill] sm:$0xff] %v3364_v17  ;;  %v2304_v44 = vpack.i.bf16 %v3362_v28, %v337_v30  ;;  %v4041_v3 = vunpack.i.h.bf16 %v3364_v17  ;;  %v2142_v58 = vunpack.i.l.bf16 %v3364_v17 }
 0x14a   : > { %4130 = vst [vmem:[#allocation68_spill] sm:$0xff] %v3373_v2  ;;  %1297 = vmatprep.subr.bf16.mxu0 %v411_v43  ;;  %462 = vrot.lane.b32.xlu1 %v3373_v2, %s2386_s19  ;;  %v3386_v15 = vpop.permute.xlu0 %2150 }
 0x14b   : > { %2305 = vrot.lane.b32.xlu0 %v2304_v44, %s2386_s19  ;;  %1298 = vmatpush1.bf16.msra.mxu0 %v410_v35  ;;  %v378_v32 = vsel %vm336_vm8, %v2142_v58, %v4041_v3  ;;  %v379_v34 = vsel %vm336_vm8, %v2132_v22, %v2142_v58 }
 0x14c   : > { %v413_v0 = vpack.c.bf16 %v2544_v33, %v378_v32  ;;  %v412_v30 = vpack.c.bf16 %v2536_v31, %v379_v34  ;;  %v2146_v61 = vpop.permute.xlu1 %2145  ;;  %v2152_v33 = vunpack.i.l.bf16 %v3386_v15 }
 0x14d   : > { %v2147_v35 = vunpack.i.l.bf16 %v2146_v61 }
 0x14e   : > { %1338 = vmatprep.subr.bf16.mxu1 %v413_v0  ;;  %v3388_v56 = vpop.permute.xlu0 %2160 }
 0x14f   : > { %1339 = vmatpush1.bf16.msra.mxu1 %v412_v30  ;;  %v4131_v30 = vunpack.i.h.bf16 %v3088_v46 }
 0x150   : > { %v3390_v8 = vpop.permute.xlu1 %2155 }
 0x151   : > { %v3402_v3 = vsel %vm336_vm8, %v4131_v30, %v2147_v35  ;;  %v4132_v30 = vunpack.i.h.bf16 %v3386_v15 }
 0x152   : > { %v3392_v59 = vpop.permute.xlu0 %2170 }
 0x153   : > { %v3419_v49 = vsel %vm336_vm8, %v2152_v33, %v4132_v30 }
 0x154   : > { %v3394_v43 = vpop.permute.xlu1 %2165 }
 0x17c   : > { %v2176_v58 = vpop.permute.xlu0 %2175  ;;  %v2181_v31 = vpop.permute.xlu1 %2180 }
 0x17d   : > { %v2178_v44 = vunpack.i.h.bf16 %v2176_v58  ;;  %v2177_v32 = vunpack.i.l.bf16 %v2176_v58  ;;  %v2183_v34 = vunpack.i.h.bf16 %v2181_v31  ;;  %v2182_v0 = vunpack.i.l.bf16 %v2181_v31 }
 0x17f   : > { %v442_v2 = vsel %vm336_vm8, %v2138_v53, %v2177_v32  ;;  %v471_v22 = vsel %vm336_vm8, %v2178_v44, %v2182_v0  ;;  %v472_v28 = vsel %vm336_vm8, %v2183_v34, %v2178_v44  ;;  %v4133_v53 = vunpack.i.h.bf16 %v3114_v26 }
 0x180   : > { %v2309_v17 = vpack.i.bf16 %v3402_v3, %v442_v2  ;;  %v3411_v58 = vpop.permute.xlu0 %2185  ;;  %v474_v31 = vpack.c.bf16 %v471_v22, %v3044_v5  ;;  %v473_v46 = vpack.c.bf16 %v472_v28, %v3052_v12  ;;  %v2148_v34 = vunpack.i.h.bf16 %v2146_v61 }
 0x181   : > { %v3425_v32 = vsel %vm336_vm8, %v4133_v53, %v2152_v33  ;;  %v2188_v2 = vunpack.i.h.bf16 %v3411_v58  ;;  %v2187_v44 = vunpack.i.l.bf16 %v3411_v58  ;;  %v542_v5 = vpack.c.bf16 %v3086_v37, %v2575_v47  ;;  %v4180_v58 = vld [vmem:[#allocation6_spill] sm:$0xff] }
 0x182   : > { %1299 = vmatprep.subr.bf16.mxu0 %v474_v31  ;;  %2310 = vrot.lane.b32.xlu0 %v2309_v17, %s2386_s19  ;;  %v2319_v28 = vpack.i.bf16 %v3419_v49, %v3425_v32  ;;  %v541_v47 = vpack.c.bf16 %v3082_v21, %v2595_v54  ;;  %v544_v53 = vpack.c.bf16 %v3106_v42, %v2587_v52  ;;  %v2157_v21 = vunpack.i.l.bf16 %v3390_v8 }
 0x183   : > { %1300 = vmatpush1.bf16.msra.mxu0 %v473_v46  ;;  %v469_v12 = vsel %vm336_vm8, %v2187_v44, %v2188_v2  ;;  %v470_v26 = vsel %vm336_vm8, %v2182_v0, %v2187_v44  ;;  %v3446_v0 = vsel %vm336_vm8, %v2147_v35, %v2148_v34 }
 0x184   : > { %v2196_v22 = vpop.permute.xlu1 %2195  ;;  %1301 = vmatprep.subr.bf16.mxu0 %v542_v5  ;;  %v2191_v61 = vpop.permute.xlu0 %2190  ;;  %v476_v17 = vpack.c.bf16 %v469_v12, %v3071_v39  ;;  %v475_v37 = vpack.c.bf16 %v470_v26, %v3048_v10  ;;  %v543_v26 = vpack.c.bf16 %v3078_v41, %v2583_v51  ;;  %v4134_v51 = vunpack.i.h.bf16 %v3161_v50 }
 0x185   : > { %v2198_v33 = vunpack.i.h.bf16 %v2196_v22  ;;  %v2197_v31 = vunpack.i.l.bf16 %v2196_v22  ;;  %v2193_v46 = vunpack.i.h.bf16 %v2191_v61  ;;  %v2192_v30 = vunpack.i.l.bf16 %v2191_v61 }
 0x186   : > { %2320 = vrot.lane.b32.xlu0 %v2319_v28, %s2386_s19  ;;  %1340 = vmatprep.subr.bf16.mxu1 %v476_v17  ;;  %v2163_v28 = vunpack.i.h.bf16 %v3388_v56  ;;  %v2162_v22 = vunpack.i.l.bf16 %v3388_v56  ;;  %v3480_v41 = vsel %vm336_vm8, %v4134_v51, %v2157_v21  ;;  %v4135_v17 = vunpack.i.h.bf16 %v3386_v15 }
 0x187   : > { %v533_v39 = vsel %vm336_vm8, %v2148_v34, %v2192_v30  ;;  %1302 = vmatpush1.bf16.msra.mxu0 %v541_v47  ;;  %1341 = vmatpush1.bf16.msra.mxu1 %v475_v37  ;;  %v576_v54 = vsel %vm336_vm8, %v2193_v46, %v2197_v31  ;;  %v577_v10 = vsel %vm336_vm8, %v2198_v33, %v2193_v46 }
 0x188   : > { %v2314_v35 = vpack.i.bf16 %v533_v39, %v3446_v0  ;;  %v3459_v44 = vpop.permute.xlu1 %2200  ;;  %1342 = vmatprep.subr.bf16.mxu1 %v544_v53  ;;  %v607_v52 = vpack.c.bf16 %v2616_v4, %v576_v54  ;;  %v606_v42 = vpack.c.bf16 %v2647_v19, %v577_v10  ;;  %v3495_v15 = vsel %vm336_vm8, %v2162_v22, %v2163_v28 }
 0x189   : > { %v2203_v34 = vunpack.i.h.bf16 %v3459_v44  ;;  %v2202_v5 = vunpack.i.l.bf16 %v3459_v44  ;;  %v2206_v12 = vpop.permute.xlu0 %2205  ;;  %v4136_v54 = vunpack.i.h.bf16 %v3184_v29  ;;  %v4186_v44 = vld [vmem:[#allocation7_spill] sm:$0xff] }
 0x18a   : > { %v2207_v61 = vunpack.i.l.bf16 %v2206_v12  ;;  %1303 = vmatprep.subr.bf16.mxu0 %v607_v52  ;;  %2315 = vrot.lane.b32.xlu1 %v2314_v35, %s2386_s19  ;;  %v2208_v30 = vunpack.i.h.bf16 %v2206_v12  ;;  %v2158_v35 = vunpack.i.h.bf16 %v3390_v8 }
 0x18b   : > { %1304 = vmatpush1.bf16.msra.mxu0 %v606_v42  ;;  %1343 = vmatpush1.bf16.msra.mxu1 %v543_v26  ;;  %v574_v4 = vsel %vm336_vm8, %v2202_v5, %v2203_v34  ;;  %v575_v19 = vsel %vm336_vm8, %v2197_v31, %v2202_v5 }
 0x18c   : > { %v638_v47 = vsel %vm336_vm8, %v4135_v17, %v2207_v61  ;;  %v2211_v37 = vpop.permute.xlu1 %2210  ;;  %v609_v33 = vpack.c.bf16 %v2634_v14, %v574_v4  ;;  %v608_v46 = vpack.c.bf16 %v2622_v7, %v575_v19  ;;  %v3501_v14 = vsel %vm336_vm8, %v4136_v54, %v2162_v22 }
 0x18d   : > { %v2324_v53 = vpack.i.bf16 %v3480_v41, %v638_v47  ;;  %v2213_v31 = vunpack.i.h.bf16 %v2211_v37  ;;  %v2212_v39 = vunpack.i.l.bf16 %v2211_v37  ;;  %v3489_v50 = vpop.permute.xlu0 %2215  ;;  %v2334_v26 = vpack.i.bf16 %v3495_v15, %v3501_v14 }
 0x18e   : > { %v2218_v7 = vunpack.i.h.bf16 %v3489_v50  ;;  %v2217_v10 = vunpack.i.l.bf16 %v3489_v50  ;;  %1344 = vmatprep.subr.bf16.mxu1 %v609_v33  ;;  %v3530_v51 = vsel %vm336_vm8, %v2157_v21, %v2158_v35  ;;  %v2167_v21 = vunpack.i.l.bf16 %v3394_v43 }
 0x18f   : > { %2325 = vrot.lane.b32.xlu1 %v2324_v53, %s2386_s19  ;;  %1345 = vmatpush1.bf16.msra.mxu1 %v608_v46  ;;  %v667_v52 = vsel %vm336_vm8, %v2208_v30, %v2212_v39  ;;  %v668_v29 = vsel %vm336_vm8, %v2213_v31, %v2208_v30  ;;  %v2173_v53 = vunpack.i.h.bf16 %v3392_v59  ;;  %v2172_v31 = vunpack.i.l.bf16 %v3392_v59 }
 0x190   : > { %v670_v42 = vpack.c.bf16 %v667_v52, %v3112_v6  ;;  %v665_v5 = vsel %vm336_vm8, %v2217_v10, %v2218_v7  ;;  %v669_v12 = vpack.c.bf16 %v668_v29, %v3128_v45  ;;  %v666_v8 = vsel %vm336_vm8, %v2212_v39, %v2217_v10 }
 0x191   : > { %v2221_v22 = vpop.permute.xlu0 %2220  ;;  %v672_v61 = vpack.c.bf16 %v665_v5, %v3140_v63  ;;  %v671_v4 = vpack.c.bf16 %v666_v8, %v3124_v1  ;;  %v738_v6 = vpack.c.bf16 %v3148_v9, %v2664_v38  ;;  %v740_v45 = vpack.c.bf16 %v3176_v16, %v2680_v55 }
 0x192   : > { %v2222_v19 = vunpack.i.l.bf16 %v2221_v22  ;;  %1305 = vmatprep.subr.bf16.mxu0 %v670_v42  ;;  %v2223_v17 = vunpack.i.h.bf16 %v2221_v22  ;;  %v737_v38 = vpack.c.bf16 %v3159_v24, %v2688_v57  ;;  %v739_v55 = vpack.c.bf16 %v3155_v62, %v2670_v40 }
 0x193   : > { %2335 = vrot.lane.b32.xlu1 %v2334_v26, %s2386_s19  ;;  %1346 = vmatprep.subr.bf16.mxu1 %v672_v61  ;;  %v3578_v56 = vsel %vm336_vm8, %v2172_v31, %v2173_v53  ;;  %v2168_v61 = vunpack.i.h.bf16 %v3394_v43 }
 0x194   : > { %v729_v63 = vsel %vm336_vm8, %v2158_v35, %v2222_v19  ;;  %1306 = vmatpush1.bf16.msra.mxu0 %v669_v12  ;;  %1347 = vmatpush1.bf16.msra.mxu1 %v671_v4  ;;  %v2226_v1 = vpop.permute.xlu1 %2225 }
 0x195   : > { %v2329_v47 = vpack.i.bf16 %v729_v63, %v3530_v51  ;;  %v2228_v37 = vunpack.i.h.bf16 %v2226_v1  ;;  %v2227_v33 = vunpack.i.l.bf16 %v2226_v1  ;;  %1307 = vmatprep.subr.bf16.mxu0 %v738_v6  ;;  %1348 = vmatprep.subr.bf16.mxu1 %v740_v45 }
 0x197   : > { %2330 = vrot.lane.b32.xlu0 %v2329_v47, %s2386_s19  ;;  %v772_v9 = vsel %vm336_vm8, %v2223_v17, %v2227_v33  ;;  %v773_v16 = vsel %vm336_vm8, %v2228_v37, %v2223_v17  ;;  %v4139_v17 = vld [vmem:[#allocation46_spill] sm:$0xff]  ;;  %v4140_v37 = vld [vmem:[#allocation44_spill] sm:$0xff] }
 0x198   : > { %1308 = vmatpush1.bf16.msra.mxu0 %v737_v38  ;;  %1349 = vmatpush1.bf16.msra.mxu1 %v739_v55  ;;  %v3545_v46 = vpop.permute.xlu1 %2230  ;;  %v803_v30 = vpack.c.bf16 %v2706_v25, %v772_v9  ;;  %v802_v57 = vpack.c.bf16 %v2737_v60, %v773_v16  ;;  %v4137_v60 = vunpack.i.h.bf16 %v3231_v36  ;;  %v4142_v55 = vld [vmem:[#allocation47_spill] sm:$0xff] }
 0x199   : > { %v2233_v40 = vunpack.i.h.bf16 %v3545_v46  ;;  %v2232_v62 = vunpack.i.l.bf16 %v3545_v46  ;;  %v2236_v24 = vpop.permute.xlu0 %2235 }
 0x19a   : > { %v2237_v39 = vunpack.i.l.bf16 %v2236_v24  ;;  %1309 = vmatprep.subr.bf16.mxu0 %v803_v30  ;;  %v3563_v10 = vsel %vm336_vm8, %v4137_v60, %v2167_v21  ;;  %v2238_v5 = vunpack.i.h.bf16 %v2236_v24  ;;  %v3613_v30 = vsel %vm336_vm8, %v2167_v21, %v2168_v61  ;;  %v4145_v60 = vld [vmem:[#allocation49_spill] sm:$0xff] }
 0x19b   : > { %v770_v54 = vsel %vm336_vm8, %v2232_v62, %v2233_v40  ;;  %v771_v25 = vsel %vm336_vm8, %v2227_v33, %v2232_v62 }
 0x19c   : > { %v834_v35 = vsel %vm336_vm8, %v2163_v28, %v2237_v39  ;;  %1310 = vmatpush1.bf16.msra.mxu0 %v802_v57  ;;  %v2241_v52 = vpop.permute.xlu1 %2240  ;;  %v805_v29 = vpack.c.bf16 %v2724_v48, %v770_v54  ;;  %v804_v42 = vpack.c.bf16 %v2712_v27, %v771_v25  ;;  %v4138_v28 = vunpack.i.h.bf16 %v3254_v11  ;;  %v4144_v25 = vld [vmem:[#allocation16_spill] sm:$0xff] }
 0x19d   : > { %v2339_v12 = vpack.i.bf16 %v3563_v10, %v834_v35  ;;  %v2243_v8 = vunpack.i.h.bf16 %v2241_v52  ;;  %v2242_v36 = vunpack.i.l.bf16 %v2241_v52  ;;  %v3572_v26 = vpop.permute.xlu0 %2245  ;;  %v4146_v35 = vld [vmem:[#allocation14_spill] sm:$0xff]  ;;  %v4147_v52 = vld [vmem:[#allocation48_spill] sm:$0xff] }
 0x19e   : > { %v3584_v48 = vsel %vm336_vm8, %v4138_v28, %v2172_v31  ;;  %v2248_v27 = vunpack.i.h.bf16 %v3572_v26  ;;  %v2247_v22 = vunpack.i.l.bf16 %v3572_v26  ;;  %1350 = vmatprep.subr.bf16.mxu1 %v805_v29  ;;  %v935_v21 = vpack.c.bf16 %v4147_v52, %v4146_v35  ;;  %v4155_v52 = vld [vmem:[#allocation52_spill] sm:$0xff] }
 0x19f   : > { %2340 = vrot.lane.b32.xlu0 %v2339_v12, %s2386_s19  ;;  %1351 = vmatpush1.bf16.msra.mxu1 %v804_v42  ;;  %v863_v4 = vsel %vm336_vm8, %v2238_v5, %v2242_v36  ;;  %v864_v11 = vsel %vm336_vm8, %v2243_v8, %v2238_v5  ;;  %v2349_v63 = vpack.i.bf16 %v3578_v56, %v3584_v48  ;;  %v4148_v12 = vld [vmem:[#allocation19_spill] sm:$0xff] }
 0x1a0   : > { %v866_v19 = vpack.c.bf16 %v863_v4, %v3182_v18  ;;  %v861_v6 = vsel %vm336_vm8, %v2247_v22, %v2248_v27  ;;  %v865_v45 = vpack.c.bf16 %v864_v11, %v3198_v23  ;;  %v862_v43 = vsel %vm336_vm8, %v2242_v36, %v2247_v22  ;;  %v4141_v18 = vld [vmem:[#allocation13_spill] sm:$0xff]  ;;  %v4143_v23 = vld [vmem:[#allocation15_spill] sm:$0xff] }
 0x1a1   : > { %v2251_v1 = vpop.permute.xlu0 %2250  ;;  %v868_v47 = vpack.c.bf16 %v861_v6, %v4139_v17  ;;  %v867_v33 = vpack.c.bf16 %v862_v43, %v4140_v37  ;;  %v934_v9 = vpack.c.bf16 %v4142_v55, %v4141_v18  ;;  %v936_v16 = vpack.c.bf16 %v3246_v13, %v4143_v23  ;;  %v4149_v36 = vld [vmem:[#allocation23_spill] sm:$0xff]  ;;  %v4151_v17 = vld [vmem:[#allocation20_spill] sm:$0xff] }
 0x1a2   : > { %v2252_v38 = vunpack.i.l.bf16 %v2251_v1  ;;  %1311 = vmatprep.subr.bf16.mxu0 %v866_v19  ;;  %v2253_v24 = vunpack.i.h.bf16 %v2251_v1  ;;  %v933_v13 = vpack.c.bf16 %v4145_v60, %v4144_v25 }
 0x1a3   : > { %2350 = vrot.lane.b32.xlu0 %v2349_v63, %s2386_s19  ;;  %1352 = vmatprep.subr.bf16.mxu1 %v868_v47  ;;  %v4150_v63 = vld [vmem:[#allocation21_spill] sm:$0xff] }
 0x1a4   : > { %v925_v57 = vsel %vm336_vm8, %v2168_v61, %v2252_v38  ;;  %1312 = vmatpush1.bf16.msra.mxu0 %v865_v45  ;;  %1353 = vmatpush1.bf16.msra.mxu1 %v867_v33  ;;  %v2256_v62 = vpop.permute.xlu1 %2255 }
 0x1a5   : > { %v2344_v31 = vpack.i.bf16 %v925_v57, %v3613_v30  ;;  %v2258_v39 = vunpack.i.h.bf16 %v2256_v62  ;;  %v2257_v54 = vunpack.i.l.bf16 %v2256_v62  ;;  %1313 = vmatprep.subr.bf16.mxu0 %v934_v9  ;;  %1354 = vmatprep.subr.bf16.mxu1 %v936_v16  ;;  %v4152_v16 = vld [vmem:[#allocation51_spill] sm:$0xff] }
 0x1a7   : > { %2345 = vrot.lane.b32.xlu1 %v2344_v31, %s2386_s19  ;;  %v968_v29 = vsel %vm336_vm8, %v2253_v24, %v2257_v54  ;;  %v969_v42 = vsel %vm336_vm8, %v2258_v39, %v2253_v24  ;;  %v4153_v24 = vld [vmem:[#allocation53_spill] sm:$0xff] }
 0x1a8   : > { %1314 = vmatpush1.bf16.msra.mxu0 %v933_v13  ;;  %1355 = vmatpush1.bf16.msra.mxu1 %v935_v21  ;;  %v3627_v5 = vpop.permute.xlu1 %2260  ;;  %v999_v8 = vpack.c.bf16 %v4148_v12, %v968_v29  ;;  %v998_v28 = vpack.c.bf16 %v4149_v36, %v969_v42  ;;  %v4154_v13 = vld [vmem:[#allocation55_spill] sm:$0xff]  ;;  %v4156_v42 = vld [vmem:[#allocation25_spill] sm:$0xff]  ;;  %v4157_v12 = vld [vmem:[#allocation56_spill] sm:$0xff] }
 0x1a9   : > { %v2263_v22 = vunpack.i.h.bf16 %v3627_v5  ;;  %v2262_v61 = vunpack.i.l.bf16 %v3627_v5  ;;  %v2266_v4 = vpop.permute.xlu0 %2265  ;;  %v4202_v5 = vld [vmem:[#allocation22_spill] sm:$0xff] }
 0x1aa   : > { %v2267_v11 = vunpack.i.l.bf16 %v2266_v4  ;;  %1315 = vmatprep.subr.bf16.mxu0 %v999_v8  ;;  %v2268_v37 = vunpack.i.h.bf16 %v2266_v4  ;;  %v1130_v8 = vpack.c.bf16 %v4157_v12, %v4156_v42  ;;  %v2367_v12 = vld [vmem:[%s2449_s10 + $0x28] sm:$0xff] }
 0x1ab   : > { %v966_v19 = vsel %vm336_vm8, %v2262_v61, %v2263_v22  ;;  %v967_v6 = vsel %vm336_vm8, %v2257_v54, %v2262_v61 }
 0x1ac   : > { %1316 = vmatpush1.bf16.msra.mxu0 %v998_v28  ;;  %v2271_v45 = vpop.permute.xlu1 %2270  ;;  %v1030_v43 = vsel %vm336_vm8, %v2173_v53, %v2267_v11  ;;  %v1001_v1 = vpack.c.bf16 %v4150_v63, %v966_v19  ;;  %v1000_v47 = vpack.c.bf16 %v4151_v17, %v967_v6  ;;  %v4158_v28 = vld [vmem:[#allocation57_spill] sm:$0xff]  ;;  %v4160_v11 = vld [vmem:[#allocation27_spill] sm:$0xff] }
 0x1ad   : > { %v2273_v33 = vunpack.i.h.bf16 %v2271_v45  ;;  %v2272_v38 = vunpack.i.l.bf16 %v2271_v45  ;;  %v3645_v18 = vpop.permute.xlu0 %2280  ;;  %1052 = vrot.lane.b32.xlu1 %v1030_v43, %s2386_s19  ;;  %v4159_v61 = vunpack.i.h.bf16 %v4158_v28  ;;  %v4161_v19 = vld [vmem:[#allocation63_spill] sm:$0xff] }
 0x1ae   : > { %v2283_v55 = vunpack.i.h.bf16 %v3645_v18  ;;  %v2282_v9 = vunpack.i.l.bf16 %v3645_v18  ;;  %1356 = vmatprep.subr.bf16.mxu1 %v1001_v1  ;;  %v1132_v6 = vpack.c.bf16 %v4161_v19, %v4160_v11  ;;  %v4204_v18 = vld [vmem:[#allocation30_spill] sm:$0xff] }
 0x1af   : > { %1357 = vmatpush1.bf16.msra.mxu1 %v1000_v47  ;;  %v1059_v59 = vsel %vm336_vm8, %v2268_v37, %v2272_v38  ;;  %v1060_v53 = vsel %vm336_vm8, %v2273_v33, %v2268_v37  ;;  %v4162_v33 = vld [vmem:[#allocation29_spill] sm:$0xff] }
 0x1b0   : > { %v2276_v23 = vpop.permute.xlu1 %2275  ;;  %v1062_v57 = vpack.c.bf16 %v1059_v59, %v4152_v16  ;;  %v1057_v62 = vsel %vm336_vm8, %v2282_v9, %v2283_v55  ;;  %v1061_v31 = vpack.c.bf16 %v1060_v53, %v4153_v24  ;;  %v1058_v39 = vsel %vm336_vm8, %v2272_v38, %v2282_v9  ;;  %v4163_v38 = vld [vmem:[#allocation60_spill] sm:$0xff]  ;;  %v4165_v16 = vld [vmem:[#allocation61_spill] sm:$0xff] }
 0x1b1   : > { %v2278_v54 = vunpack.i.h.bf16 %v2276_v23  ;;  %v2277_v25 = vunpack.i.l.bf16 %v2276_v23  ;;  %v2286_v60 = vpop.permute.xlu0 %2285  ;;  %v1064_v35 = vpack.c.bf16 %v1057_v62, %v4154_v13  ;;  %v1063_v21 = vpack.c.bf16 %v1058_v39, %v4155_v52  ;;  %v4164_v23 = vld [vmem:[#allocation26_spill] sm:$0xff] }
 0x1b2   : > { %v2287_v29 = vunpack.i.l.bf16 %v2286_v60  ;;  %1317 = vmatprep.subr.bf16.mxu0 %v1062_v57  ;;  %v2288_v1 = vunpack.i.h.bf16 %v2286_v60  ;;  %v1129_v9 = vpack.c.bf16 %v4163_v38, %v4162_v33  ;;  %v1131_v57 = vpack.c.bf16 %v4165_v16, %v4164_v23  ;;  %v4171_v38 = vld [vmem:[#allocation67_spill] sm:$0xff] }
 0x1b3   : > { %v3668_v36 = vsel %vm336_vm8, %v2277_v25, %v2278_v54  ;;  %v3674_v4 = vsel %vm336_vm8, %v4159_v61, %v2277_v25  ;;  %1358 = vmatprep.subr.bf16.mxu1 %v1064_v35  ;;  %1318 = vmatpush1.bf16.msra.mxu0 %v1061_v31  ;;  %v1279_v31 = vld [vmem:[%s3944_s2] sm:$0xff]  ;;  %v4167_v61 = vld [vmem:[#allocation58_spill] sm:$0xff]  ;;  %v4170_v33 = vmov 0  }
 0x1b4   : > { %v2354_v45 = vpack.i.bf16 %v3668_v36, %v3674_v4  ;;  %1359 = vmatpush1.bf16.msra.mxu1 %v1063_v21  ;;  %v2291_v43 = vpop.permute.xlu1 %2290  ;;  %1319 = vmatprep.subr.bf16.mxu0 %v1130_v8  ;;  %v1121_v63 = vsel %vm336_vm8, %v2278_v54, %v2287_v29  ;;  %v2388_v54 = vmov 0.0   ;;  %v4166_v8 = vld [vmem:[#allocation65_spill] sm:$0xff]  ;;  %v3713_v11 = vcombine.low %v4167_v61, %v4167_v61 }
 0x1b5   : > { %v2293_v17 = vunpack.i.h.bf16 %v2291_v43  ;;  %v2292_v47 = vunpack.i.l.bf16 %v2291_v43  ;;  %v3682_v37 = vpop.permute.xlu0 %2295  ;;  %1157 = vrot.lane.b32.xlu1 %v1121_v63, %s2386_s19  ;;  %1360 = vmatprep.subr.bf16.mxu1 %v1132_v6  ;;  %v350_v28 = vpack.c.bf16 %v4166_v8, %v2367_v12  ;;  %v2368_v6 = vld [vmem:[%s2449_s10 + $0x20] sm:$0xff]  ;;  %v2369_v63 = vld [vmem:[%s2449_s10 + $0x30] sm:$0xff]  ;;  %v4178_v12 = vld [vmem:[#allocation40_spill] sm:$0xff] }
 0x1b6   : > { %v2298_v59 = vunpack.i.h.bf16 %v3682_v37  ;;  %v2297_v53 = vunpack.i.l.bf16 %v3682_v37  ;;  %2355 = vrot.lane.b32.xlu0 %v2354_v45, %s2386_s19  ;;  %v4168_v45 = vld [vmem:[#allocation32_spill] sm:$0xff] }
 0x1b7   : > { %1320 = vmatpush1.bf16.msra.mxu0 %v1129_v9  ;;  %v1164_v62 = vsel %vm336_vm8, %v2288_v1, %v2292_v47  ;;  %v1165_v24 = vsel %vm336_vm8, %v2293_v17, %v2288_v1  ;;  %v349_v43 = vpack.c.bf16 %v4168_v45, %v2368_v6  ;;  %v4169_v1 = vld [vmem:[#allocation64_spill] sm:$0xff]  ;;  %v4172_v9 = vunpack.i.h.bf16 %v4171_v38 }
 0x1b8   : > { %1361 = vmatpush1.bf16.msra.mxu1 %v1131_v57  ;;  %v2301_v39 = vpop.permute.xlu1 %2300  ;;  %v1167_v25 = vpack.c.bf16 %v2388_v54, %v1164_v62  ;;  %v1162_v60 = vsel %vm336_vm8, %v2297_v53, %v2298_v59  ;;  %v1166_v13 = vpack.c.bf16 %v2388_v54, %v1165_v24  ;;  %v1163_v35 = vsel %vm336_vm8, %v2292_v47, %v2297_v53  ;;  %v4173_v57 = vld [vmem:[#allocation3_spill] sm:$0xff] }
 0x1b9   : > { %v2303_v52 = vunpack.i.h.bf16 %v2301_v39  ;;  %v2302_v21 = vunpack.i.l.bf16 %v2301_v39  ;;  %v1169_v29 = vpack.c.bf16 %v2388_v54, %v1162_v60  ;;  %v1168_v42 = vpack.c.bf16 %v2388_v54, %v1163_v35 }
 0x1ba   : > { %1321 = vmatprep.subr.bf16.mxu0 %v1167_v25  ;;  %1282 = vperm.xlu0 %2359, %v1279_v31   ;;  %v351_v17 = vpack.c.bf16 %v4169_v1, %v2369_v63  ;;  %v4174_v25 = vld [vmem:[#allocation4_spill] sm:$0xff] }
 0x1bb   : > { %1362 = vmatprep.subr.bf16.mxu1 %v1169_v29  ;;  %1322 = vmatpush1.bf16.msra.mxu0 %v1166_v13  ;;  %v376_v19 = vsel %vm336_vm8, %v2302_v21, %v2303_v52  ;;  %v377_v53 = vsel %vm336_vm8, %v4172_v9, %v2302_v21  ;;  %v4175_v13 = vld [vmem:[#allocation31_spill] sm:$0xff]  ;;  %v4182_v63 = vld [vmem:[#allocation68_spill] sm:$0xff] }
 0x1bc   : > { %1363 = vmatpush1.bf16.msra.mxu1 %v1168_v42  ;;  %1377 = vmatprep.subr.bf16.mxu0 %v350_v28  ;;  %v415_v62 = vpack.c.bf16 %v4173_v57, %v376_v19  ;;  %v463_v24 = vpop.permute.xlu1 %462  ;;  %v414_v60 = vpack.c.bf16 %v4174_v25, %v377_v53  ;;  %v4176_v21 = vld [vmem:[#allocation59_spill] sm:$0xff]  ;;  %v4179_v28 = vld [vmem:[#allocation5_spill] sm:$0xff] }
 0x1bd   : > { %v2306_v47 = vpop.permute.xlu0 %2305  ;;  %1418 = vmatprep.subr.bf16.mxu1 %v4170_v33  ;;  %v546_v61 = vpack.c.bf16 %v3402_v3, %v4179_v28  ;;  %v4181_v19 = vld [vmem:[#allocation41_spill] sm:$0xff]  ;;  %v4183_v3 = vld [vmem:[#allocation34_spill] sm:$0xff] }
 0x1be   : > { %v2308_v23 = vunpack.i.h.bf16 %v2306_v47  ;;  %v2307_v16 = vunpack.i.l.bf16 %v2306_v47  ;;  %1328 = vmatmul.mubr.bf16.vlgmr.msra.gmra.mrb[0].mxu0 %v3713_v11  ;;  %v547_v53 = vpack.c.bf16 %v3446_v0, %v4183_v3 }
 0x1bf   : > { %1369 = vmatmul.mubr.bf16.vlgmr.msra.gmra.mrb[0].mxu1 %v3713_v11  ;;  %1378 = vmatpush1.bf16.msra.mxu0 %v349_v43 }
 0x1c0   : > { %v375_v31 = vsel %vm336_vm8, %v2303_v52, %v2307_v16  ;;  %1419 = vmatpush1.bf16.msra.mxu1 %v351_v17  ;;  %1379 = vmatprep.subr.bf16.mxu0 %v415_v62  ;;  %v467_v39 = vsel %vm336_vm8, %v2308_v23, %v463_v24  ;;  %v468_v29 = vsel %vm336_vm8, %v2188_v2, %v2308_v23  ;;  %v4177_v52 = vld [vmem:[#allocation66_spill] sm:$0xff] }
 0x1c1   : > { %v416_v35 = vpack.c.bf16 %v4175_v13, %v375_v31  ;;  %1420 = vmatprep.subr.bf16.mxu1 %v4170_v33  ;;  %1782 = vmatprep.mubr.msk.bf16.mxu1 %vm1291_vm9, %v4176_v21  ;;  %v478_v42 = vpack.c.bf16 %v467_v39, %v4177_v52  ;;  %v477_v8 = vpack.c.bf16 %v468_v29, %v4178_v12  ;;  %v4184_v39 = vld [vmem:[#allocation33_spill] sm:$0xff]  ;;  %v4187_v12 = vld [vmem:[#allocation42_spill] sm:$0xff] }
 0x1c2   : > { %1781 = vmatprep.mubr.msk.bf16.mxu0 %vm1291_vm9, %v4176_v21  ;;  %v545_v2 = vpack.c.bf16 %v4181_v19, %v4180_v58 }
 0x1c3   : > { %1380 = vmatpush1.bf16.msra.mxu0 %v414_v60  ;;  %v4185_v60 = vld [vmem:[#allocation8_spill] sm:$0xff] }
 0x1c4   : > { %1421 = vmatpush1.bf16.msra.mxu1 %v416_v35  ;;  %1381 = vmatprep.subr.bf16.mxu0 %v478_v42 }
 0x1c5   : > { %1422 = vmatprep.subr.bf16.mxu1 %v4170_v33 }
 0x1c7   : > { %1382 = vmatpush1.bf16.msra.mxu0 %v477_v8 }
 0x1c8   : > { %1383 = vmatprep.subr.bf16.mxu0 %v546_v61  ;;  %v4188_v61 = vld [vmem:[#allocation9_spill] sm:$0xff] }
 0x1cb   : > { %1384 = vmatpush1.bf16.msra.mxu0 %v545_v2  ;;  %v4189_v2 = vld [vmem:[#allocation10_spill] sm:$0xff] }
 0x1f4   : > { %v2311_v6 = vpop.permute.xlu0 %2310 }
 0x1f5   : > { %v2312_v45 = vunpack.i.l.bf16 %v2311_v6  ;;  %v2313_v47 = vunpack.i.h.bf16 %v2311_v6  ;;  %v4190_v6 = vld [vmem:[#allocation43_spill] sm:$0xff] }
 0x1f7   : > { %v466_v43 = vsel %vm336_vm8, %v463_v24, %v2312_v45  ;;  %v573_v62 = vsel %vm336_vm8, %v2203_v34, %v2313_v47  ;;  %v741_v45 = vpack.c.bf16 %v4190_v6, %v4189_v2 }
 0x1f8   : > { %v479_v1 = vpack.c.bf16 %v466_v43, %v4182_v63  ;;  %v2321_v17 = vpop.permute.xlu0 %2320  ;;  %v610_v35 = vpack.c.bf16 %v4186_v44, %v573_v62  ;;  %v4191_v43 = vld [vmem:[#allocation37_spill] sm:$0xff] }
 0x1f9   : > { %v2323_v38 = vunpack.i.h.bf16 %v2321_v17  ;;  %v2322_v9 = vunpack.i.l.bf16 %v2321_v17  ;;  %v743_v63 = vpack.c.bf16 %v3530_v51, %v4191_v43  ;;  %v4203_v43 = vld [vmem:[#allocation54_spill] sm:$0xff] }
 0x1fa   : > { %1423 = vmatpush1.bf16.msra.mxu1 %v479_v1 }
 0x1fb   : > { %1424 = vmatprep.subr.bf16.mxu1 %v4170_v33  ;;  %v663_v0 = vsel %vm336_vm8, %v2322_v9, %v2323_v38  ;;  %v664_v34 = vsel %vm336_vm8, %v2218_v7, %v2322_v9  ;;  %v742_v7 = vpack.c.bf16 %v3480_v41, %v4188_v61  ;;  %v4192_v9 = vld [vmem:[#allocation35_spill] sm:$0xff] }
 0x1fc   : > { %v2316_v23 = vpop.permute.xlu1 %2315  ;;  %v674_v52 = vpack.c.bf16 %v663_v0, %v3425_v32  ;;  %v673_v8 = vpack.c.bf16 %v664_v34, %v4187_v12 }
 0x1fd   : > { %v2318_v16 = vunpack.i.h.bf16 %v2316_v23  ;;  %v2317_v57 = vunpack.i.l.bf16 %v2316_v23  ;;  %v4194_v23 = vld [vmem:[#allocation11_spill] sm:$0xff] }
 0x1fe   : > { %1425 = vmatpush1.bf16.msra.mxu1 %v547_v53  ;;  %v4193_v53 = vld [vmem:[#allocation12_spill] sm:$0xff] }
 0x1ff   : > { %v571_v24 = vsel %vm336_vm8, %v2317_v57, %v2318_v16  ;;  %1426 = vmatprep.subr.bf16.mxu1 %v4170_v33  ;;  %v572_v31 = vsel %vm336_vm8, %v2313_v47, %v2317_v57 }
 0x200   : > { %v612_v25 = vpack.c.bf16 %v4184_v39, %v571_v24  ;;  %v611_v13 = vpack.c.bf16 %v4185_v60, %v572_v31  ;;  %v4195_v24 = vld [vmem:[#allocation45_spill] sm:$0xff] }
 0x201   : > { %v2326_v21 = vpop.permute.xlu1 %2325  ;;  %v4196_v39 = vld [vmem:[#allocation17_spill] sm:$0xff] }
 0x202   : > { %v2327_v29 = vunpack.i.l.bf16 %v2326_v21  ;;  %1385 = vmatprep.subr.bf16.mxu0 %v611_v13  ;;  %1427 = vmatpush1.bf16.msra.mxu1 %v612_v25  ;;  %v2328_v58 = vunpack.i.h.bf16 %v2326_v21  ;;  %v938_v25 = vpack.c.bf16 %v3563_v10, %v4196_v39  ;;  %v4198_v13 = vld [vmem:[#allocation50_spill] sm:$0xff] }
 0x203   : > { %1386 = vmatpush1.bf16.msra.mxu0 %v610_v35  ;;  %1428 = vmatprep.subr.bf16.mxu1 %v4170_v33 }
 0x204   : > { %v662_v42 = vsel %vm336_vm8, %v2323_v38, %v2327_v29  ;;  %1387 = vmatprep.subr.bf16.mxu0 %v674_v52  ;;  %v769_v41 = vsel %vm336_vm8, %v2233_v40, %v2328_v58  ;;  %v4199_v29 = vld [vmem:[#allocation38_spill] sm:$0xff] }
 0x205   : > { %v675_v28 = vpack.c.bf16 %v662_v42, %v3419_v49  ;;  %v2336_v50 = vpop.permute.xlu1 %2335  ;;  %v806_v16 = vpack.c.bf16 %v4194_v23, %v769_v41  ;;  %v939_v10 = vpack.c.bf16 %v3613_v30, %v4199_v29 }
 0x206   : > { %v2338_v19 = vunpack.i.h.bf16 %v2336_v50  ;;  %v2337_v32 = vunpack.i.l.bf16 %v2336_v50  ;;  %v4200_v50 = vld [vmem:[#allocation36_spill] sm:$0xff] }
 0x207   : > { %1429 = vmatpush1.bf16.msra.mxu1 %v675_v28  ;;  %1388 = vmatpush1.bf16.msra.mxu0 %v673_v8 }
 0x208   : > { %1389 = vmatprep.subr.bf16.mxu0 %v742_v7  ;;  %1430 = vmatprep.subr.bf16.mxu1 %v4170_v33  ;;  %v859_v51 = vsel %vm336_vm8, %v2337_v32, %v2338_v19  ;;  %v860_v40 = vsel %vm336_vm8, %v2248_v27, %v2337_v32  ;;  %v4201_v7 = vld [vmem:[#allocation24_spill] sm:$0xff] }
 0x209   : > { %v2331_v1 = vpop.permute.xlu0 %2330  ;;  %v870_v57 = vpack.c.bf16 %v859_v51, %v3501_v14  ;;  %v869_v31 = vpack.c.bf16 %v860_v40, %v4195_v24  ;;  %v4197_v14 = vld [vmem:[#allocation18_spill] sm:$0xff] }
 0x20a   : > { %v2333_v49 = vunpack.i.h.bf16 %v2331_v1  ;;  %v2332_v17 = vunpack.i.l.bf16 %v2331_v1  ;;  %v937_v44 = vpack.c.bf16 %v4198_v13, %v4197_v14  ;;  %v4205_v1 = vld [vmem:[#allocation39_spill] sm:$0xff] }
 0x20b   : > { %1431 = vmatpush1.bf16.msra.mxu1 %v743_v63  ;;  %1390 = vmatpush1.bf16.msra.mxu0 %v741_v45 }
 0x20c   : > { %v767_v47 = vsel %vm336_vm8, %v2332_v17, %v2333_v49  ;;  %1432 = vmatprep.subr.bf16.mxu1 %v4170_v33  ;;  %v768_v38 = vsel %vm336_vm8, %v2328_v58, %v2332_v17  ;;  %v4206_v49 = vld [vmem:[#allocation28_spill] sm:$0xff]  ;;  %v4207_v17 = vld [vmem:[#allocation62_spill] sm:$0xff] }
 0x20d   : > { %v808_v3 = vpack.c.bf16 %v4192_v9, %v767_v47  ;;  %v807_v46 = vpack.c.bf16 %v4193_v53, %v768_v38  ;;  %v1133_v41 = vpack.c.bf16 %v4207_v17, %v4206_v49 }
 0x20f   : > { %1391 = vmatprep.subr.bf16.mxu0 %v807_v46  ;;  %1433 = vmatpush1.bf16.msra.mxu1 %v808_v3 }
 0x210   : > { %1392 = vmatpush1.bf16.msra.mxu0 %v806_v16  ;;  %1434 = vmatprep.subr.bf16.mxu1 %v4170_v33 }
 0x211   : > { %v2341_v62 = vpop.permute.xlu0 %2340  ;;  %1393 = vmatprep.subr.bf16.mxu0 %v870_v57 }
 0x212   : > { %v2342_v0 = vunpack.i.l.bf16 %v2341_v62  ;;  %v2343_v35 = vunpack.i.h.bf16 %v2341_v62 }
 0x214   : > { %v858_v26 = vsel %vm336_vm8, %v2338_v19, %v2342_v0  ;;  %1394 = vmatpush1.bf16.msra.mxu0 %v869_v31  ;;  %v1458_v31 = vld [vmem:[%s3949_s7] sm:$0xff]  ;;  %v4208_v0 = vlaneseq }
 0x215   : > { %v871_v27 = vpack.c.bf16 %v858_v26, %v3495_v15  ;;  %v2351_v60 = vpop.permute.xlu0 %2350  ;;  %1395 = vmatprep.subr.bf16.mxu0 %v938_v25  ;;  %v965_v15 = vsel %vm336_vm8, %v2263_v22, %v2343_v35  ;;  %vm1459_vm10 = vcmp.ne.f32.partialorder %v1458_v31, 0.0 }
 0x216   : > { %v2353_v21 = vunpack.i.h.bf16 %v2351_v60  ;;  %v2352_v34 = vunpack.i.l.bf16 %v2351_v60  ;;  %v1002_v19 = vpack.c.bf16 %v4202_v5, %v965_v15  ;;  %v1462_v39 = vshrl.u32 %v4208_v0, 7 }
 0x217   : > { %1435 = vmatpush1.bf16.msra.mxu1 %v871_v27  ;;  %v1460_v27 = vsel %vm1459_vm10, 1, %v4170_v33 }
 0x218   : > { %1396 = vmatpush1.bf16.msra.mxu0 %v937_v44  ;;  %1436 = vmatprep.subr.bf16.mxu1 %v4170_v33  ;;  %v1055_v30 = vsel %vm336_vm8, %v2352_v34, %v2353_v21  ;;  %v1056_v22 = vsel %vm336_vm8, %v2283_v55, %v2352_v34  ;;  %v1134_v55 = vpack.c.bf16 %v3674_v4, %v4204_v18  ;;  %v1463_v25 = vsub.s32 0, %v1462_v39 }
 0x219   : > { %v2346_v52 = vpop.permute.xlu1 %2345  ;;  %v1066_v2 = vpack.c.bf16 %v1055_v30, %v3584_v48  ;;  %v1065_v63 = vpack.c.bf16 %v1056_v22, %v4203_v43  ;;  %v1135_v48 = vpack.c.bf16 %v3668_v36, %v4205_v1  ;;  %v1467_v26 = vsub.s32 1, %v1462_v39 }
 0x21a   : > { %v2348_v42 = vunpack.i.h.bf16 %v2346_v52  ;;  %v2347_v12 = vunpack.i.l.bf16 %v2346_v52  ;;  %v1464_v60 = vrot.slane %v1460_v27, %v1463_v25  ;;  %v1471_v13 = vsub.s32 2, %v1462_v39  ;;  %v1529_v25 = vld [vmem:[%s3945_s3] sm:$0xff] }
 0x21b   : > { %1437 = vmatpush1.bf16.msra.mxu1 %v939_v10  ;;  %v1468_v14 = vrot.slane %v1460_v27, %v1467_v26  ;;  %v1475_v34 = vsub.s32 3, %v1462_v39  ;;  %v1483_v15 = vsub.s32 5, %v1462_v39 }
 0x21c   : > { %v963_v8 = vsel %vm336_vm8, %v2347_v12, %v2348_v42  ;;  %1438 = vmatprep.subr.bf16.mxu1 %v4170_v33  ;;  %v964_v28 = vsel %vm336_vm8, %v2343_v35, %v2347_v12  ;;  %vm1489_vm11 = vcmp.eq.s32.totalorder %v1464_v60, 1  ;;  %v1479_v12 = vsub.s32 4, %v1462_v39 }
 0x21d   : > { %v1004_v61 = vpack.c.bf16 %v4200_v50, %v963_v8  ;;  %v1003_v58 = vpack.c.bf16 %v4201_v7, %v964_v28  ;;  %vm1490_vm12 = vcmp.eq.s32.totalorder %v1468_v14, 1  ;;  %v1476_v42 = vrot.slane %v1460_v27, %v1475_v34 }
 0x21e   : > { %v1484_v7 = vrot.slane %v1460_v27, %v1483_v15 }
 0x21f   : > { %v1053_v32 = vpop.permute.xlu1 %1052  ;;  %1397 = vmatprep.subr.bf16.mxu0 %v1003_v58  ;;  %1439 = vmatpush1.bf16.msra.mxu1 %v1004_v61  ;;  %vm1492_vm14 = vcmp.eq.s32.totalorder %v1476_v42, 1  ;;  %v1480_v61 = vrot.slane %v1460_v27, %v1479_v12 }
 0x220   : > { %v1054_v6 = vsel %vm336_vm8, %v2353_v21, %v1053_v32  ;;  %1398 = vmatpush1.bf16.msra.mxu0 %v1002_v19  ;;  %1440 = vmatprep.subr.bf16.mxu1 %v4170_v33  ;;  %v1472_v21 = vrot.slane %v1460_v27, %v1471_v13  ;;  %vm1494_vm1 = vcmp.eq.s32.totalorder %v1484_v7, 1  ;;  %v1611_v13 = vld [vmem:[%s3947_s5] sm:$0xff] }
 0x221   : > { %v1067_v45 = vpack.c.bf16 %v1054_v6, %v3578_v56  ;;  %1399 = vmatprep.subr.bf16.mxu0 %v1066_v2  ;;  %vm1493_vm0 = vcmp.eq.s32.totalorder %v1480_v61, 1 }
 0x222   : > { %vm1491_vm13 = vcmp.eq.s32.totalorder %v1472_v21, 1 }
 0x223   : > { %1441 = vmatpush1.bf16.msra.mxu1 %v1067_v45 }
 0x224   : > { %1400 = vmatpush1.bf16.msra.mxu0 %v1065_v63  ;;  %1442 = vmatprep.subr.bf16.mxu1 %v4170_v33 }
 0x225   : > { %1401 = vmatprep.subr.bf16.mxu0 %v1134_v55 }
 0x227   : > { %1443 = vmatpush1.bf16.msra.mxu1 %v1135_v48  ;;  %v1158_v51 = vpop.permute.xlu1 %1157 }
 0x228   : > { %1402 = vmatpush1.bf16.msra.mxu0 %v1133_v41  ;;  %v2356_v56 = vpop.permute.xlu0 %2355  ;;  %1444 = vmatprep.subr.bf16.mxu1 %v4170_v33  ;;  %v1487_v33 = vsub.s32 6, %v1462_v39 }
 0x229   : > { %v2358_v47 = vunpack.i.h.bf16 %v2356_v56  ;;  %v2357_v38 = vunpack.i.l.bf16 %v2356_v56 }
 0x22a   : > { %v1488_v50 = vrot.slane %v1460_v27, %v1487_v33 }
 0x22b   : > { %v1159_v4 = vsel %vm336_vm8, %v2358_v47, %v1158_v51  ;;  %v1161_v36 = vsel %vm336_vm8, %v2298_v59, %v2357_v38  ;;  %v1160_v9 = vsel %vm336_vm8, %v2357_v38, %v2358_v47 }
 0x22c   : > { %v1170_v3 = vpack.c.bf16 %v2388_v54, %v1161_v36  ;;  %v1172_v53 = vpack.c.bf16 %v2388_v54, %v1159_v4  ;;  %v1171_v46 = vpack.c.bf16 %v2388_v54, %v1160_v9  ;;  %vm1495_vm15 = vcmp.eq.s32.totalorder %v1488_v50, 1 }
 0x22e   : > { %1403 = vmatprep.subr.bf16.mxu0 %v1171_v46  ;;  %1445 = vmatpush1.bf16.msra.mxu1 %v1172_v53 }
 0x22f   : > { %1404 = vmatpush1.bf16.msra.mxu0 %v1170_v3  ;;  %1797 = vmatprep.subr.mxu1 %v2388_v54 }
 0x230   : > { %1792 = vmatprep.subr.mxu0 %v2388_v54 }
 0x231   : > { %1451 = vmatmul.mubr.bf16.vlgmr.msra.gmra.mrb[4].mxu1 %v3713_v11 }
 0x232   : > { %1410 = vmatmul.mubr.bf16.vlgmr.msra.gmra.mrb[4].mxu0 %v3713_v11  ;;  %1799 = vmatprep.mubr.msk.f32.mxu1 %vm2389_vm2, %v2388_v54 }
 0x233   : > { %1794 = vmatprep.mubr.msk.f32.mxu0 %vm2389_vm2, %v2388_v54 }
 0x239   : > { %v1283_v11 = vpop.permute.xlu0 %1282 }
 0x291   : > { %v1329_v37 = vpop.f32.mrb[0].mxu0 }
 0x292   : > { %v1331_v59 = vpop.f32.mrb[1].mxu0  ;;  %v1370_v23 = vpop.f32.mrb[0].mxu1  ;;  %v3871_v44 = vadd.f32 %v1329_v37, %v1283_v11 }
 0x293   : > { %v1333_v16 = vpop.f32.mrb[2].mxu0  ;;  %v1372_v40 = vpop.f32.mrb[1].mxu1  ;;  %v3873_v35 = vadd.f32 %v1331_v59, %v1283_v11  ;;  %v3879_v52 = vadd.f32 %v1370_v23, %v1283_v11 }
 0x294   : > { %v1334_v57 = vpop.f32.mrb[3].mxu0  ;;  %v1374_v62 = vpop.f32.mrb[2].mxu1  ;;  %v1496_v29 = vsel %vm1489_vm11, %v3871_v44, 0.0  ;;  %v3883_v30 = vadd.f32 %v1372_v40, %v1283_v11  ;;  %v1512_v45 = vsel %vm1489_vm11, %v3871_v44, -3e+38 }
 0x295   : > { %v1375_v24 = vpop.f32.mrb[3].mxu1  ;;  %v1497_v10 = vsel %vm1490_vm12, %v3873_v35, 0.0  ;;  %v1498_v28 = vsel %vm1491_vm13, %v3879_v52, 0.0  ;;  %v1514_v18 = vsel %vm1491_vm13, %v3879_v52, -3e+38  ;;  %v1612_v62 = vld [vmem:[%s3948_s6] sm:$0xff] }
 0x296   : > { %v1503_v8 = vadd.f32 %v1497_v10, %v1496_v29  ;;  %v1499_v5 = vsel %vm1492_vm14, %v3883_v30, 0.0  ;;  %v1513_v41 = vsel %vm1490_vm12, %v3873_v35, -3e+38  ;;  %v1515_v46 = vsel %vm1492_vm14, %v3883_v30, -3e+38  ;;  %v1530_v24 = vld [vmem:[%s3946_s4] sm:$0xff] }
 0x298   : > { %v1504_v58 = vadd.f32 %v1503_v8, %v1498_v28 }
 0x29a   : > { %v1505_v55 = vadd.f32 %v1504_v58, %v1499_v5 }
 0x304   : > { %v1452_v19 = vpop.f32.mrb[4].mxu1 }
 0x305   : > { %v3887_v22 = vadd.f32 %v1452_v19, %v1283_v11  ;;  %v1411_v32 = vpop.f32.mrb[4].mxu0  ;;  %v1454_v2 = vpop.f32.mrb[5].mxu1 }
 0x306   : > { %v3889_v6 = vadd.f32 %v1411_v32, %v1283_v11  ;;  %v1413_v43 = vpop.f32.mrb[5].mxu0  ;;  %v1455_v63 = vpop.f32.mrb[6].mxu1 }
 0x307   : > { %v1518_v1 = vsel %vm1495_vm15, %v3887_v22, -3e+38  ;;  %v3897_v48 = vadd.f32 %v1413_v43, %v1283_v11  ;;  %v1415_v49 = vpop.f32.mrb[6].mxu0  ;;  %v1456_v17 = vpop.f32.mrb[7].mxu1  ;;  %v1502_v59 = vsel %vm1495_vm15, %v3887_v22, 0.0 }
 0x308   : > { %v1521_v56 = vmax.f32 %v1514_v18, %v1518_v1  ;;  %v1500_v47 = vsel %vm1493_vm0, %v3889_v6, 0.0  ;;  %v1516_v38 = vsel %vm1493_vm0, %v3889_v6, -3e+38  ;;  %v1416_v51 = vpop.f32.mrb[7].mxu0 }
 0x309   : > { %v1506_v4 = vadd.f32 %v1505_v55, %v1500_v47  ;;  %v1519_v36 = vmax.f32 %v1512_v45, %v1516_v38  ;;  %v1501_v9 = vsel %vm1494_vm1, %v3897_v48, 0.0  ;;  %v1517_v3 = vsel %vm1494_vm1, %v3897_v48, -3e+38 }
 0x30a   : > { %v1520_v53 = vmax.f32 %v1513_v41, %v1517_v3  ;;  %v1523_v16 = vmax.f32 %v1521_v56, %v1515_v46 }
 0x30b   : > { %v1507_v37 = vadd.f32 %v1506_v4, %v1501_v9 }
 0x30c   : > { %v1522_v23 = vmax.f32 %v1519_v36, %v1520_v53 }
 0x30d   : > { %v1508_v40 = vadd.f32 %v1507_v37, %v1502_v59 }
 0x30e   : > { %v1524_v57 = vmax.f32 %v1522_v23, %v1523_v16 }
 0x30f   : > { %1509 = vadd.xlane.f32.xlu1 %v1508_v40 }
 0x310   : > { %1525 = vmax.xlane.f32.xlu0 %v1524_v57 }
 0x320   : > { %1533 = vperm.xlu1 %2360, %v1530_v24  }
 0x326   : > { %1615 = vperm.xlu0 %2359, %v1612_v62  }
 0x39c   : > { %v1510_v31 = vpop.xlane.xlu1 %1509 }
 0x39d   : > { %v1511_v0 = vmul.f32 0.001953125, %v1510_v31  ;;  %v1526_v39 = vpop.xlane.xlu0 %1525 }
 0x39f   : > { %v1528_v54 = vsel %vm1527_vm3, %v1511_v0, %v1526_v39 }
 0x3a0   : > { %1793 = vmatpush3.msra.mxu0 %v1528_v54  ;;  %v1534_v26 = vpop.permute.xlu1 %1533 }
 0x3a1   : > { %1795 = vmatmul.mubr.msk.f32.vlgmr.msra.gmra.mrb[8].mxu0 %vm1536_vm4, %v1529_v25 }
 0x3a5   : > { %v1616_v20 = vpop.permute.xlu0 %1615 }
 0x474   : > { %v1606_v27 = vpop.f32.mrb[8].mxu0 }
 0x475   : > { %v1607_v11 = vadd.f32 %v1606_v27, %v1534_v26  ;;  %v1796_v60 = vpop.f32.mrb[9].mxu0 }
 0x477   : > { %v1610_v14 = vmax.f32 %v1607_v11, 0.0 }
 0x479   : > { %1798 = vmatpush3.msra.mxu1 %v1610_v14 }
 0x47a   : > { %1800 = vmatmul.mubr.msk.f32.vlgmr.msra.gmra.mrb[8].mxu1 %vm1536_vm4, %v1611_v13 }
 0x54d   : > { %v1687_v21 = vpop.f32.mrb[8].mxu1 }
 0x54e   : > { %v1688_v34 = vadd.f32 %v1687_v21, %v1616_v20  ;;  %v1801_v29 = vpop.f32.mrb[9].mxu1 }
 0x550   : > { %v1692_v10 = vsel %vm1691_vm5, %v1688_v34, 0.0 }
 0x551   : > { %1693 = vadd.xlane.f32.xlu1 %v1692_v10 }
 0x5de   : > { %v1694_v33 = vpop.xlane.xlu1 %1693 }
 0x5df   : > { %v1785_v42 = vmul.f32 -1.442695, %v1694_v33 }
 0x5e1   : > { %2363 = vpow2.f32 %v1785_v42 }
 0x5eb   : > { %v2364_v12 = vpop.eup %2363 }
 0x5ec   : > { %v1698_v15 = vadd.f32 1.0, %v2364_v12 }
 0x5ee   : > { %2365 = vrcp.f32 %v1698_v15 }
 0x5f8   : > { %v2366_v8 = vpop.eup %2365 }
 0x5f9   : > { %v1701_v28 = vmul.f32 %v2366_v8, %v3871_v44  ;;  %v1702_v50 = vmul.f32 %v2366_v8, %v3873_v35  ;;  %v1703_v61 = vmul.f32 %v2366_v8, %v3879_v52  ;;  %v1704_v7 = vmul.f32 %v2366_v8, %v3883_v30 }
 0x5fa   : > { %v1705_v58 = vmul.f32 %v2366_v8, %v3889_v6  ;;  %v1706_v5 = vmul.f32 %v2366_v8, %v3897_v48  ;;  %v1707_v19 = vmul.f32 %v2366_v8, %v3887_v22 }
 0x5fb   : > { %1708 = vst [vmem:[%s305_s17] sm:$0xff] %v1701_v28  ;;  %1709 = vst [vmem:[%s305_s17 + $0x8] sm:$0xff] %v1702_v50 }
 0x5fc   : > { %1710 = vst [vmem:[%s305_s17 + $0x10] sm:$0xff] %v1703_v61  ;;  %1711 = vst [vmem:[%s305_s17 + $0x18] sm:$0xff] %v1704_v7 }
 0x5fd   : > { %1712 = vst [vmem:[%s305_s17 + $0x20] sm:$0xff] %v1705_v58  ;;  %1713 = vst [vmem:[%s305_s17 + $0x28] sm:$0xff] %v1706_v5 }
 0x5fe   : > { %1714 = vst [vmem:[%s305_s17 + $0x30] sm:$0xff] %v1707_v19 }
 0x5ff PF: > { %s18_s27 = sadd.s32 1, %s2376_s27  }
 0x600   : > { %p15_p4 = scmp.ge.s32.totalorder %s18_s27, 4  }
 0x602   :  { %17 = sbr.rel (!%p15_p4) target bundleno = 1 (0x1), region = 82 }

</bundles_post_ra>
